<compile_context>
chip_gen: v7x
topology: tpu7x:2x2x1
jax: 0.10.0
libtpu: 0.0.40
codegen_flags: <defaults>
</compile_context>

<pallas_src>
import functools

import jax
import jax.numpy as jnp
from jax.experimental import pallas as pl
from jax.experimental.pallas import tpu as pltpu

LANE = 128
SUBLANE = 8


def _round_up(x, m):
    return ((x + m - 1) // m) * m


# ------------------------------ fused kernel ---------------------------------
def fused_lstm_kernel(x_ref, wih1_ref, whh1_ref, b1_ref,
                      wih2_ref, whh2_ref, b2_ref, wp_ref, bp_ref,
                      out_ref, xw_sc):
    # x_ref:    [T*B, E]  bf16  time-major input, batch padded to sublane mult.
    # wih1_ref: [E, G]    bf16  layer-1 input->gate weights, gates tight-packed
    # whh1_ref: [H, G]    bf16  layer-1 recurrent weights
    # b1_ref:   [1, G]    f32   layer-1 bias (b_ih + b_hh)
    # wih2_ref: [H, G]    bf16  layer-2 input weights
    # whh2_ref: [H, G]    bf16  layer-2 recurrent weights
    # b2_ref:   [1, G]    f32
    # wp_ref:   [H, OP]   bf16  predictor weights (output lane-padded)
    # bp_ref:   [1, OP]   f32
    # out_ref:  [B, OP]   f32
    # xw_sc:    [T*B, G]  f32   scratch: hoisted layer-1 input projection
    B = out_ref.shape[0]
    TB, G = xw_sc.shape
    T = TB // B
    H = whh1_ref.shape[0]

    # ---- hoisted layer-1 input projection: ONE big MXU call, bias folded ----
    xw_sc[...] = jnp.dot(x_ref[...], wih1_ref[...],
                         preferred_element_type=jnp.float32) + b1_ref[...]

    # ---- constants hoisted out of the recurrence (no per-step broadcasts) ----
    # Gate order along the packed 128-lane tile: [ i | f | g | o ], each width H.
    lane = jax.lax.broadcasted_iota(jnp.int32, (B, G), 1)
    is_g = (lane >= 2 * H) & (lane < 3 * H)
    # sigmoid(x) = 0.5*tanh(0.5*x) + 0.5  -> one EUP tanh covers all 4 gates.
    pre_scale = jnp.where(is_g, 1.0, 0.5)
    post_mul = jnp.where(is_g, 1.0, 0.5)
    post_add = jnp.where(is_g, 0.0, 0.5)
    b2b = jnp.broadcast_to(b2_ref[...], (B, G))   # hoisted layer-2 bias

    def activate(gates):
        # [B, G] -> [ sig(i) | sig(f) | tanh(g) | sig(o) ] with a single tanh.
        t = jnp.tanh(gates * pre_scale)
        return t * post_mul + post_add

    def cell(act, c):
        # Static lane slices of the activated gate tile (XLU rotates, cheap).
        i_g = act[:, 0 * H:1 * H]
        f_g = act[:, 1 * H:2 * H]
        g_g = act[:, 2 * H:3 * H]
        o_g = act[:, 3 * H:4 * H]
        c_new = f_g * c + i_g * g_g
        h_new = o_g * jnp.tanh(c_new)
        return h_new, c_new

    def step(t, carry):
        h1, c1, h2, c2 = carry
        # layer 1: only the tiny [B,H]x[H,G] recurrent GEMM is on the serial path
        g1 = xw_sc[pl.ds(t * B, B)] + jnp.dot(
            h1.astype(jnp.bfloat16), whh1_ref[...],
            preferred_element_type=jnp.float32)
        h1, c1 = cell(activate(g1), c1)
        # layer 2: two small dots (no concat); v7x MRB accumulates in place
        g2 = (jnp.dot(h1.astype(jnp.bfloat16), wih2_ref[...],
                      preferred_element_type=jnp.float32)
              + jnp.dot(h2.astype(jnp.bfloat16), whh2_ref[...],
                        preferred_element_type=jnp.float32)
              + b2b)
        h2, c2 = cell(activate(g2), c2)
        return h1, c1, h2, c2

    z = jnp.zeros((B, H), jnp.float32)
    _, _, h2, _ = jax.lax.fori_loop(0, T, step, (z, z, z, z), unroll=True)

    # predictor head on the final layer-2 hidden state (lane-dense output)
    out_ref[...] = (jnp.dot(h2.astype(jnp.bfloat16), wp_ref[...],
                            preferred_element_type=jnp.float32)
                    + bp_ref[...]).astype(out_ref.dtype)


# --------------------------- parameter preparation ----------------------------
def prepare_params(params, hidden_size, out_dim=9):
    H = hidden_size
    G = _round_up(4 * H, LANE)          # tight-packed gate width (128 for H=32)
    OP = _round_up(out_dim, LANE)

    def pad_gates(w):                   # [Din, 4H] -> [Din, G]; gates stay tight
        return jnp.pad(w, ((0, 0), (0, G - 4 * H)))

    wih1 = pad_gates(params["w_ih1"]).astype(jnp.bfloat16)
    whh1 = pad_gates(params["w_hh1"]).astype(jnp.bfloat16)
    b1 = pad_gates(params["b1"])
    wih2 = pad_gates(params["w_ih2"]).astype(jnp.bfloat16)
    whh2 = pad_gates(params["w_hh2"]).astype(jnp.bfloat16)
    b2 = pad_gates(params["b2"])
    wp = jnp.pad(params["wp"], ((0, 0), (0, OP - out_dim))).astype(jnp.bfloat16)
    bp = jnp.pad(params["bp"], ((0, 0), (0, OP - out_dim)))
    return wih1, whh1, b1, wih2, whh2, b2, wp, bp


# --------------------------------- forward ------------------------------------
@functools.partial(jax.jit, static_argnames=("hidden_size", "out_dim"))
def my_first_lstm_forward(seq, params, hidden_size, out_dim=9):
    # seq: [B, T, E] batch-first (PyTorch convention)
    B, T, E = seq.shape
    H = hidden_size
    G = _round_up(4 * H, LANE)
    OP = _round_up(out_dim, LANE)
    Bp = _round_up(max(B, SUBLANE), SUBLANE)

    # time-major, batch padded to sublane multiple, flattened + cast to bf16
    # (transpose/pad/reshape/cast fuse into one tiny XLA op over ~4 KiB).
    x_tm = jnp.transpose(seq, (1, 0, 2))                      # [T, B, E]
    x_tm = jnp.pad(x_tm, ((0, 0), (0, Bp - B), (0, 0)))       # [T, Bp, E]
    x2d = x_tm.reshape(T * Bp, E).astype(jnp.bfloat16)

    prep = prepare_params(params, hidden_size, out_dim)

    flops = 2 * (T * Bp * E * G           # hoisted input projection
                 + T * Bp * H * G         # layer-1 recurrence
                 + T * Bp * 2 * H * G     # layer-2 (two dots)
                 + Bp * H * OP)           # predictor head
    transcendentals = T * 2 * (Bp * G + Bp * H)
    bytes_accessed = (x2d.size * x2d.dtype.itemsize
                      + sum(p.size * p.dtype.itemsize for p in prep)
                      + 4 * Bp * OP)

    vmem = pl.BlockSpec(memory_space=pltpu.MemorySpace.VMEM)
    out_pad = pl.pallas_call(
        fused_lstm_kernel,
        out_shape=jax.ShapeDtypeStruct((Bp, OP), jnp.float32),
        in_specs=[vmem] * 9,
        out_specs=vmem,
        scratch_shapes=[pltpu.VMEM((T * Bp, G), jnp.float32)],
        cost_estimate=pl.CostEstimate(flops=flops,
                                      transcendentals=transcendentals,
                                      bytes_accessed=bytes_accessed),
    )(x2d, *prep)
    return out_pad[:B, :out_dim]


# ----------------------------- parameter creation ------------------------------
def init_params(key, embedding_dim, hidden_size, out_dim=9):
    k = 1.0 / (hidden_size ** 0.5)
    keys = jax.random.split(key, 10)

    def u(kk, shape, bound):
        return jax.random.uniform(kk, shape, jnp.float32, -bound, bound)

    params = {
        # lstm1: weight_ih (4H, E) -> stored transposed (E, 4H); gate order i,f,g,o
        "w_ih1": u(keys[0], (embedding_dim, 4 * hidden_size), k),
        "w_hh1": u(keys[1], (hidden_size, 4 * hidden_size), k),
        "b1": (u(keys[2], (1, 4 * hidden_size), k)
               + u(keys[3], (1, 4 * hidden_size), k)),          # b_ih + b_hh
        # lstm2
        "w_ih2": u(keys[4], (hidden_size, 4 * hidden_size), k),
        "w_hh2": u(keys[5], (hidden_size, 4 * hidden_size), k),
        "b2": (u(keys[6], (1, 4 * hidden_size), k)
               + u(keys[7], (1, 4 * hidden_size), k)),
        # predictor: Linear(hidden_size, 9), stored transposed (H, 9)
        "wp": u(keys[8], (hidden_size, out_dim), k),
        "bp": u(keys[9], (1, out_dim), k),
    }
    return params


# --------------------------- pure-JAX f32 reference ----------------------------
def reference_forward(seq, params):
    def lstm(x_tm, w_ih, w_hh, b):
        B = x_tm.shape[1]
        H = w_hh.shape[0]

        def step(carry, x_t):
            h, c = carry
            gates = x_t @ w_ih + h @ w_hh + b
            i = jax.nn.sigmoid(gates[:, 0 * H:1 * H])
            f = jax.nn.sigmoid(gates[:, 1 * H:2 * H])
            g = jnp.tanh(gates[:, 2 * H:3 * H])
            o = jax.nn.sigmoid(gates[:, 3 * H:4 * H])
            c = f * c + i * g
            h = o * jnp.tanh(c)
            return (h, c), h

        init = (jnp.zeros((B, H), jnp.float32), jnp.zeros((B, H), jnp.float32))
        (h, _), out = jax.lax.scan(step, init, x_tm)
        return out, h

    x_tm = jnp.transpose(seq, (1, 0, 2))
    out1, _ = lstm(x_tm, params["w_ih1"], params["w_hh1"], params["b1"])
    _, h2 = lstm(out1, params["w_ih2"], params["w_hh2"], params["b2"])
    return h2 @ params["wp"] + params["bp"]


if __name__ == "__main__":
    B, T, E, H = 2, 8, 32, 32
    key = jax.random.PRNGKey(0)
    k_in, k_par = jax.random.split(key)
    seq = jax.random.normal(k_in, (B, T, E), dtype=jnp.float32)
    params = init_params(k_par, embedding_dim=E, hidden_size=H)

    preds = my_first_lstm_forward(seq, params, hidden_size=H)
    preds = jax.block_until_ready(preds)
    assert preds.shape == (B, 9)

    ref = reference_forward(seq, params)
    assert bool(jnp.all(jnp.isfinite(preds)))
    assert jnp.allclose(preds, ref, atol=3e-2, rtol=3e-2), \
        float(jnp.max(jnp.abs(preds - ref)))
    print("KERNEL_OK")
</pallas_src>

<mosaic_0001>
module attributes {stable_mosaic.version = 11 : i64} {
  func.func @fused_lstm_kernel(%arg0: memref<64x32xbf16, #tpu.memory_space<vmem>>, %arg1: memref<32x128xbf16, #tpu.memory_space<vmem>>, %arg2: memref<32x128xbf16, #tpu.memory_space<vmem>>, %arg3: memref<1x128xf32, #tpu.memory_space<vmem>>, %arg4: memref<32x128xbf16, #tpu.memory_space<vmem>>, %arg5: memref<32x128xbf16, #tpu.memory_space<vmem>>, %arg6: memref<1x128xf32, #tpu.memory_space<vmem>>, %arg7: memref<32x128xbf16, #tpu.memory_space<vmem>>, %arg8: memref<1x128xf32, #tpu.memory_space<vmem>>, %arg9: memref<8x128xf32, #tpu.memory_space<vmem>>, %arg10: memref<64x128xf32, #tpu.memory_space<vmem>>) attributes {dimension_semantics = [], scalar_prefetch = 0 : i64, scratch_operands = 1 : i64, tpu.core_type = #tpu.core_type<tc>} {
    %c0 = arith.constant 0 : index
    %c0_0 = arith.constant 0 : index
    %0 = vector.load %arg0[%c0, %c0_0] : memref<64x32xbf16, #tpu.memory_space<vmem>>, vector<64x32xbf16>
    %c0_1 = arith.constant 0 : index
    %c0_2 = arith.constant 0 : index
    %1 = vector.load %arg1[%c0_1, %c0_2] : memref<32x128xbf16, #tpu.memory_space<vmem>>, vector<32x128xbf16>
    %cst = arith.constant dense<0.000000e+00> : vector<64x128xf32>
    %2 = tpu.matmul %0, %1, %cst {dimension_numbers = #tpu.dot_dimension_numbers<[1], [0], [0], [1], [0, 0, 1, 1], [], []>} : vector<64x32xbf16>, vector<32x128xbf16>, vector<64x128xf32> -> vector<64x128xf32>
    %c0_3 = arith.constant 0 : index
    %c0_4 = arith.constant 0 : index
    %3 = vector.load %arg3[%c0_3, %c0_4] : memref<1x128xf32, #tpu.memory_space<vmem>>, vector<1x128xf32>
    %4 = vector.broadcast %3 : vector<1x128xf32> to vector<64x128xf32>
    %5 = arith.addf %2, %4 : vector<64x128xf32>
    %c0_5 = arith.constant 0 : index
    %c0_6 = arith.constant 0 : index
    %6 = vector.load %arg10[%c0_5, %c0_6] : memref<64x128xf32, #tpu.memory_space<vmem>>, vector<64x128xf32>
    tpu.vector_store %arg10[%c0_5, %c0_6], %5 {strides = array<i32>} : memref<64x128xf32, #tpu.memory_space<vmem>>, vector<64x128xf32>,
    %7 = tpu.iota {dimensions = array<i32: 1>} : vector<8x128xi32>
    %c64_i32 = arith.constant 64 : i32
    %8 = vector.broadcast %c64_i32 : i32 to vector<8x128xi32>
    %9 = arith.cmpi sge, %7, %8 : vector<8x128xi32>
    %c96_i32 = arith.constant 96 : i32
    %10 = vector.broadcast %c96_i32 : i32 to vector<8x128xi32>
    %11 = arith.cmpi slt, %7, %10 : vector<8x128xi32>
    %12 = arith.andi %9, %11 : vector<8x128xi1>
    %cst_7 = arith.constant 1.000000e+00 : f32
    %cst_8 = arith.constant 5.000000e-01 : f32
    %13 = vector.broadcast %cst_7 : f32 to vector<8x128xf32>
    %14 = vector.broadcast %cst_8 : f32 to vector<8x128xf32>
    %15 = arith.select %12, %13, %14 : vector<8x128xi1>, vector<8x128xf32>
    %cst_9 = arith.constant 1.000000e+00 : f32
    %cst_10 = arith.constant 5.000000e-01 : f32
    %16 = vector.broadcast %cst_9 : f32 to vector<8x128xf32>
    %17 = vector.broadcast %cst_10 : f32 to vector<8x128xf32>
    %18 = arith.select %12, %16, %17 : vector<8x128xi1>, vector<8x128xf32>
    %cst_11 = arith.constant 0.000000e+00 : f32
    %cst_12 = arith.constant 5.000000e-01 : f32
    %19 = vector.broadcast %cst_11 : f32 to vector<8x128xf32>
    %20 = vector.broadcast %cst_12 : f32 to vector<8x128xf32>
    %21 = arith.select %12, %19, %20 : vector<8x128xi1>, vector<8x128xf32>
    %c0_13 = arith.constant 0 : index
    %c0_14 = arith.constant 0 : index
    %22 = vector.load %arg6[%c0_13, %c0_14] : memref<1x128xf32, #tpu.memory_space<vmem>>, vector<1x128xf32>
    %23 = vector.shape_cast %22 : vector<1x128xf32> to vector<1x128xf32>
    %24 = vector.broadcast %23 : vector<1x128xf32> to vector<8x128xf32>
    %cst_15 = arith.constant 0.000000e+00 : f32
    %25 = vector.broadcast %cst_15 : f32 to vector<8x32xf32>
    %c0_i32 = arith.constant 0 : i32
    %c8_i32 = arith.constant 8 : i32
    %26 = arith.muli %c0_i32, %c8_i32 : i32
    %27 = arith.index_cast %26 : i32 to index
    %c0_16 = arith.constant 0 : index
    %28 = vector.load %arg10[%27, %c0_16] : memref<64x128xf32, #tpu.memory_space<vmem>>, vector<8x128xf32>
    %29 = arith.truncf %25 : vector<8x32xf32> to vector<8x32xbf16>
    %c0_17 = arith.constant 0 : index
    %c0_18 = arith.constant 0 : index
    %30 = vector.load %arg2[%c0_17, %c0_18] : memref<32x128xbf16, #tpu.memory_space<vmem>>, vector<32x128xbf16>
    %cst_19 = arith.constant dense<0.000000e+00> : vector<8x128xf32>
    %31 = tpu.matmul %29, %30, %cst_19 {dimension_numbers = #tpu.dot_dimension_numbers<[1], [0], [0], [1], [0, 0, 1, 1], [], []>} : vector<8x32xbf16>, vector<32x128xbf16>, vector<8x128xf32> -> vector<8x128xf32>
    %32 = arith.addf %28, %31 : vector<8x128xf32>
    %33 = arith.mulf %32, %15 : vector<8x128xf32>
    %34 = math.tanh %33 : vector<8x128xf32>
    %35 = arith.mulf %34, %18 : vector<8x128xf32>
    %36 = arith.addf %35, %21 : vector<8x128xf32>
    %37 = vector.extract_strided_slice %36 {offsets = [0, 0], sizes = [8, 32], strides = [1, 1]} : vector<8x128xf32> to vector<8x32xf32>
    %38 = vector.extract_strided_slice %36 {offsets = [0, 32], sizes = [8, 32], strides = [1, 1]} : vector<8x128xf32> to vector<8x32xf32>
    %39 = vector.extract_strided_slice %36 {offsets = [0, 64], sizes = [8, 32], strides = [1, 1]} : vector<8x128xf32> to vector<8x32xf32>
    %40 = vector.extract_strided_slice %36 {offsets = [0, 96], sizes = [8, 32], strides = [1, 1]} : vector<8x128xf32> to vector<8x32xf32>
    %41 = arith.mulf %38, %25 : vector<8x32xf32>
    %42 = arith.mulf %37, %39 : vector<8x32xf32>
    %43 = arith.addf %41, %42 : vector<8x32xf32>
    %44 = math.tanh %43 : vector<8x32xf32>
    %45 = arith.mulf %40, %44 : vector<8x32xf32>
    %46 = arith.truncf %45 : vector<8x32xf32> to vector<8x32xbf16>
    %c0_20 = arith.constant 0 : index
    %c0_21 = arith.constant 0 : index
    %47 = vector.load %arg4[%c0_20, %c0_21] : memref<32x128xbf16, #tpu.memory_space<vmem>>, vector<32x128xbf16>
    %cst_22 = arith.constant dense<0.000000e+00> : vector<8x128xf32>
    %48 = tpu.matmul %46, %47, %cst_22 {dimension_numbers = #tpu.dot_dimension_numbers<[1], [0], [0], [1], [0, 0, 1, 1], [], []>} : vector<8x32xbf16>, vector<32x128xbf16>, vector<8x128xf32> -> vector<8x128xf32>
    %49 = arith.truncf %25 : vector<8x32xf32> to vector<8x32xbf16>
    %c0_23 = arith.constant 0 : index
    %c0_24 = arith.constant 0 : index
    %50 = vector.load %arg5[%c0_23, %c0_24] : memref<32x128xbf16, #tpu.memory_space<vmem>>, vector<32x128xbf16>
    %cst_25 = arith.constant dense<0.000000e+00> : vector<8x128xf32>
    %51 = tpu.matmul %49, %50, %cst_25 {dimension_numbers = #tpu.dot_dimension_numbers<[1], [0], [0], [1], [0, 0, 1, 1], [], []>} : vector<8x32xbf16>, vector<32x128xbf16>, vector<8x128xf32> -> vector<8x128xf32>
    %52 = arith.addf %48, %51 : vector<8x128xf32>
    %53 = arith.addf %52, %24 : vector<8x128xf32>
    %54 = arith.mulf %53, %15 : vector<8x128xf32>
    %55 = math.tanh %54 : vector<8x128xf32>
    %56 = arith.mulf %55, %18 : vector<8x128xf32>
    %57 = arith.addf %56, %21 : vector<8x128xf32>
    %58 = vector.extract_strided_slice %57 {offsets = [0, 0], sizes = [8, 32], strides = [1, 1]} : vector<8x128xf32> to vector<8x32xf32>
    %59 = vector.extract_strided_slice %57 {offsets = [0, 32], sizes = [8, 32], strides = [1, 1]} : vector<8x128xf32> to vector<8x32xf32>
    %60 = vector.extract_strided_slice %57 {offsets = [0, 64], sizes = [8, 32], strides = [1, 1]} : vector<8x128xf32> to vector<8x32xf32>
    %61 = vector.extract_strided_slice %57 {offsets = [0, 96], sizes = [8, 32], strides = [1, 1]} : vector<8x128xf32> to vector<8x32xf32>
    %62 = arith.mulf %59, %25 : vector<8x32xf32>
    %63 = arith.mulf %58, %60 : vector<8x32xf32>
    %64 = arith.addf %62, %63 : vector<8x32xf32>
    %65 = math.tanh %64 : vector<8x32xf32>
    %66 = arith.mulf %61, %65 : vector<8x32xf32>
    %c1_i32 = arith.constant 1 : i32
    %c8_i32_26 = arith.constant 8 : i32
    %67 = arith.muli %c1_i32, %c8_i32_26 : i32
    %68 = arith.index_cast %67 : i32 to index
    %c0_27 = arith.constant 0 : index
    %69 = vector.load %arg10[%68, %c0_27] : memref<64x128xf32, #tpu.memory_space<vmem>>, vector<8x128xf32>
    %70 = arith.truncf %45 : vector<8x32xf32> to vector<8x32xbf16>
    %c0_28 = arith.constant 0 : index
    %c0_29 = arith.constant 0 : index
    %71 = vector.load %arg2[%c0_28, %c0_29] : memref<32x128xbf16, #tpu.memory_space<vmem>>, vector<32x128xbf16>
    %cst_30 = arith.constant dense<0.000000e+00> : vector<8x128xf32>
    %72 = tpu.matmul %70, %71, %cst_30 {dimension_numbers = #tpu.dot_dimension_numbers<[1], [0], [0], [1], [0, 0, 1, 1], [], []>} : vector<8x32xbf16>, vector<32x128xbf16>, vector<8x128xf32> -> vector<8x128xf32>
    %73 = arith.addf %69, %72 : vector<8x128xf32>
    %74 = arith.mulf %73, %15 : vector<8x128xf32>
    %75 = math.tanh %74 : vector<8x128xf32>
    %76 = arith.mulf %75, %18 : vector<8x128xf32>
    %77 = arith.addf %76, %21 : vector<8x128xf32>
    %78 = vector.extract_strided_slice %77 {offsets = [0, 0], sizes = [8, 32], strides = [1, 1]} : vector<8x128xf32> to vector<8x32xf32>
    %79 = vector.extract_strided_slice %77 {offsets = [0, 32], sizes = [8, 32], strides = [1, 1]} : vector<8x128xf32> to vector<8x32xf32>
    %80 = vector.extract_strided_slice %77 {offsets = [0, 64], sizes = [8, 32], strides = [1, 1]} : vector<8x128xf32> to vector<8x32xf32>
    %81 = vector.extract_strided_slice %77 {offsets = [0, 96], sizes = [8, 32], strides = [1, 1]} : vector<8x128xf32> to vector<8x32xf32>
    %82 = arith.mulf %79, %43 : vector<8x32xf32>
    %83 = arith.mulf %78, %80 : vector<8x32xf32>
    %84 = arith.addf %82, %83 : vector<8x32xf32>
    %85 = math.tanh %84 : vector<8x32xf32>
    %86 = arith.mulf %81, %85 : vector<8x32xf32>
    %87 = arith.truncf %86 : vector<8x32xf32> to vector<8x32xbf16>
    %c0_31 = arith.constant 0 : index
    %c0_32 = arith.constant 0 : index
    %88 = vector.load %arg4[%c0_31, %c0_32] : memref<32x128xbf16, #tpu.memory_space<vmem>>, vector<32x128xbf16>
    %cst_33 = arith.constant dense<0.000000e+00> : vector<8x128xf32>
    %89 = tpu.matmul %87, %88, %cst_33 {dimension_numbers = #tpu.dot_dimension_numbers<[1], [0], [0], [1], [0, 0, 1, 1], [], []>} : vector<8x32xbf16>, vector<32x128xbf16>, vector<8x128xf32> -> vector<8x128xf32>
    %90 = arith.truncf %66 : vector<8x32xf32> to vector<8x32xbf16>
    %c0_34 = arith.constant 0 : index
    %c0_35 = arith.constant 0 : index
    %91 = vector.load %arg5[%c0_34, %c0_35] : memref<32x128xbf16, #tpu.memory_space<vmem>>, vector<32x128xbf16>
    %cst_36 = arith.constant dense<0.000000e+00> : vector<8x128xf32>
    %92 = tpu.matmul %90, %91, %cst_36 {dimension_numbers = #tpu.dot_dimension_numbers<[1], [0], [0], [1], [0, 0, 1, 1], [], []>} : vector<8x32xbf16>, vector<32x128xbf16>, vector<8x128xf32> -> vector<8x128xf32>
    %93 = arith.addf %89, %92 : vector<8x128xf32>
    %94 = arith.addf %93, %24 : vector<8x128xf32>
    %95 = arith.mulf %94, %15 : vector<8x128xf32>
    %96 = math.tanh %95 : vector<8x128xf32>
    %97 = arith.mulf %96, %18 : vector<8x128xf32>
    %98 = arith.addf %97, %21 : vector<8x128xf32>
    %99 = vector.extract_strided_slice %98 {offsets = [0, 0], sizes = [8, 32], strides = [1, 1]} : vector<8x128xf32> to vector<8x32xf32>
    %100 = vector.extract_strided_slice %98 {offsets = [0, 32], sizes = [8, 32], strides = [1, 1]} : vector<8x128xf32> to vector<8x32xf32>
    %101 = vector.extract_strided_slice %98 {offsets = [0, 64], sizes = [8, 32], strides = [1, 1]} : vector<8x128xf32> to vector<8x32xf32>
    %102 = vector.extract_strided_slice %98 {offsets = [0, 96], sizes = [8, 32], strides = [1, 1]} : vector<8x128xf32> to vector<8x32xf32>
    %103 = arith.mulf %100, %64 : vector<8x32xf32>
    %104 = arith.mulf %99, %101 : vector<8x32xf32>
    %105 = arith.addf %103, %104 : vector<8x32xf32>
    %106 = math.tanh %105 : vector<8x32xf32>
    %107 = arith.mulf %102, %106 : vector<8x32xf32>
    %c2_i32 = arith.constant 2 : i32
    %c8_i32_37 = arith.constant 8 : i32
    %108 = arith.muli %c2_i32, %c8_i32_37 : i32
    %109 = arith.index_cast %108 : i32 to index
    %c0_38 = arith.constant 0 : index
    %110 = vector.load %arg10[%109, %c0_38] : memref<64x128xf32, #tpu.memory_space<vmem>>, vector<8x128xf32>
    %111 = arith.truncf %86 : vector<8x32xf32> to vector<8x32xbf16>
    %c0_39 = arith.constant 0 : index
    %c0_40 = arith.constant 0 : index
    %112 = vector.load %arg2[%c0_39, %c0_40] : memref<32x128xbf16, #tpu.memory_space<vmem>>, vector<32x128xbf16>
    %cst_41 = arith.constant dense<0.000000e+00> : vector<8x128xf32>
    %113 = tpu.matmul %111, %112, %cst_41 {dimension_numbers = #tpu.dot_dimension_numbers<[1], [0], [0], [1], [0, 0, 1, 1], [], []>} : vector<8x32xbf16>, vector<32x128xbf16>, vector<8x128xf32> -> vector<8x128xf32>
    %114 = arith.addf %110, %113 : vector<8x128xf32>
    %115 = arith.mulf %114, %15 : vector<8x128xf32>
    %116 = math.tanh %115 : vector<8x128xf32>
    %117 = arith.mulf %116, %18 : vector<8x128xf32>
    %118 = arith.addf %117, %21 : vector<8x128xf32>
    %119 = vector.extract_strided_slice %118 {offsets = [0, 0], sizes = [8, 32], strides = [1, 1]} : vector<8x128xf32> to vector<8x32xf32>
    %120 = vector.extract_strided_slice %118 {offsets = [0, 32], sizes = [8, 32], strides = [1, 1]} : vector<8x128xf32> to vector<8x32xf32>
    %121 = vector.extract_strided_slice %118 {offsets = [0, 64], sizes = [8, 32], strides = [1, 1]} : vector<8x128xf32> to vector<8x32xf32>
    %122 = vector.extract_strided_slice %118 {offsets = [0, 96], sizes = [8, 32], strides = [1, 1]} : vector<8x128xf32> to vector<8x32xf32>
    %123 = arith.mulf %120, %84 : vector<8x32xf32>
    %124 = arith.mulf %119, %121 : vector<8x32xf32>
    %125 = arith.addf %123, %124 : vector<8x32xf32>
    %126 = math.tanh %125 : vector<8x32xf32>
    %127 = arith.mulf %122, %126 : vector<8x32xf32>
    %128 = arith.truncf %127 : vector<8x32xf32> to vector<8x32xbf16>
    %c0_42 = arith.constant 0 : index
    %c0_43 = arith.constant 0 : index
    %129 = vector.load %arg4[%c0_42, %c0_43] : memref<32x128xbf16, #tpu.memory_space<vmem>>, vector<32x128xbf16>
    %cst_44 = arith.constant dense<0.000000e+00> : vector<8x128xf32>
    %130 = tpu.matmul %128, %129, %cst_44 {dimension_numbers = #tpu.dot_dimension_numbers<[1], [0], [0], [1], [0, 0, 1, 1], [], []>} : vector<8x32xbf16>, vector<32x128xbf16>, vector<8x128xf32> -> vector<8x128xf32>
    %131 = arith.truncf %107 : vector<8x32xf32> to vector<8x32xbf16>
    %c0_45 = arith.constant 0 : index
    %c0_46 = arith.constant 0 : index
    %132 = vector.load %arg5[%c0_45, %c0_46] : memref<32x128xbf16, #tpu.memory_space<vmem>>, vector<32x128xbf16>
    %cst_47 = arith.constant dense<0.000000e+00> : vector<8x128xf32>
    %133 = tpu.matmul %131, %132, %cst_47 {dimension_numbers = #tpu.dot_dimension_numbers<[1], [0], [0], [1], [0, 0, 1, 1], [], []>} : vector<8x32xbf16>, vector<32x128xbf16>, vector<8x128xf32> -> vector<8x128xf32>
    %134 = arith.addf %130, %133 : vector<8x128xf32>
    %135 = arith.addf %134, %24 : vector<8x128xf32>
    %136 = arith.mulf %135, %15 : vector<8x128xf32>
    %137 = math.tanh %136 : vector<8x128xf32>
    %138 = arith.mulf %137, %18 : vector<8x128xf32>
    %139 = arith.addf %138, %21 : vector<8x128xf32>
    %140 = vector.extract_strided_slice %139 {offsets = [0, 0], sizes = [8, 32], strides = [1, 1]} : vector<8x128xf32> to vector<8x32xf32>
    %141 = vector.extract_strided_slice %139 {offsets = [0, 32], sizes = [8, 32], strides = [1, 1]} : vector<8x128xf32> to vector<8x32xf32>
    %142 = vector.extract_strided_slice %139 {offsets = [0, 64], sizes = [8, 32], strides = [1, 1]} : vector<8x128xf32> to vector<8x32xf32>
    %143 = vector.extract_strided_slice %139 {offsets = [0, 96], sizes = [8, 32], strides = [1, 1]} : vector<8x128xf32> to vector<8x32xf32>
    %144 = arith.mulf %141, %105 : vector<8x32xf32>
    %145 = arith.mulf %140, %142 : vector<8x32xf32>
    %146 = arith.addf %144, %145 : vector<8x32xf32>
    %147 = math.tanh %146 : vector<8x32xf32>
    %148 = arith.mulf %143, %147 : vector<8x32xf32>
    %c3_i32 = arith.constant 3 : i32
    %c8_i32_48 = arith.constant 8 : i32
    %149 = arith.muli %c3_i32, %c8_i32_48 : i32
    %150 = arith.index_cast %149 : i32 to index
    %c0_49 = arith.constant 0 : index
    %151 = vector.load %arg10[%150, %c0_49] : memref<64x128xf32, #tpu.memory_space<vmem>>, vector<8x128xf32>
    %152 = arith.truncf %127 : vector<8x32xf32> to vector<8x32xbf16>
    %c0_50 = arith.constant 0 : index
    %c0_51 = arith.constant 0 : index
    %153 = vector.load %arg2[%c0_50, %c0_51] : memref<32x128xbf16, #tpu.memory_space<vmem>>, vector<32x128xbf16>
    %cst_52 = arith.constant dense<0.000000e+00> : vector<8x128xf32>
    %154 = tpu.matmul %152, %153, %cst_52 {dimension_numbers = #tpu.dot_dimension_numbers<[1], [0], [0], [1], [0, 0, 1, 1], [], []>} : vector<8x32xbf16>, vector<32x128xbf16>, vector<8x128xf32> -> vector<8x128xf32>
    %155 = arith.addf %151, %154 : vector<8x128xf32>
    %156 = arith.mulf %155, %15 : vector<8x128xf32>
    %157 = math.tanh %156 : vector<8x128xf32>
    %158 = arith.mulf %157, %18 : vector<8x128xf32>
    %159 = arith.addf %158, %21 : vector<8x128xf32>
    %160 = vector.extract_strided_slice %159 {offsets = [0, 0], sizes = [8, 32], strides = [1, 1]} : vector<8x128xf32> to vector<8x32xf32>
    %161 = vector.extract_strided_slice %159 {offsets = [0, 32], sizes = [8, 32], strides = [1, 1]} : vector<8x128xf32> to vector<8x32xf32>
    %162 = vector.extract_strided_slice %159 {offsets = [0, 64], sizes = [8, 32], strides = [1, 1]} : vector<8x128xf32> to vector<8x32xf32>
    %163 = vector.extract_strided_slice %159 {offsets = [0, 96], sizes = [8, 32], strides = [1, 1]} : vector<8x128xf32> to vector<8x32xf32>
    %164 = arith.mulf %161, %125 : vector<8x32xf32>
    %165 = arith.mulf %160, %162 : vector<8x32xf32>
    %166 = arith.addf %164, %165 : vector<8x32xf32>
    %167 = math.tanh %166 : vector<8x32xf32>
    %168 = arith.mulf %163, %167 : vector<8x32xf32>
    %169 = arith.truncf %168 : vector<8x32xf32> to vector<8x32xbf16>
    %c0_53 = arith.constant 0 : index
    %c0_54 = arith.constant 0 : index
    %170 = vector.load %arg4[%c0_53, %c0_54] : memref<32x128xbf16, #tpu.memory_space<vmem>>, vector<32x128xbf16>
    %cst_55 = arith.constant dense<0.000000e+00> : vector<8x128xf32>
    %171 = tpu.matmul %169, %170, %cst_55 {dimension_numbers = #tpu.dot_dimension_numbers<[1], [0], [0], [1], [0, 0, 1, 1], [], []>} : vector<8x32xbf16>, vector<32x128xbf16>, vector<8x128xf32> -> vector<8x128xf32>
    %172 = arith.truncf %148 : vector<8x32xf32> to vector<8x32xbf16>
    %c0_56 = arith.constant 0 : index
    %c0_57 = arith.constant 0 : index
    %173 = vector.load %arg5[%c0_56, %c0_57] : memref<32x128xbf16, #tpu.memory_space<vmem>>, vector<32x128xbf16>
    %cst_58 = arith.constant dense<0.000000e+00> : vector<8x128xf32>
    %174 = tpu.matmul %172, %173, %cst_58 {dimension_numbers = #tpu.dot_dimension_numbers<[1], [0], [0], [1], [0, 0, 1, 1], [], []>} : vector<8x32xbf16>, vector<32x128xbf16>, vector<8x128xf32> -> vector<8x128xf32>
    %175 = arith.addf %171, %174 : vector<8x128xf32>
    %176 = arith.addf %175, %24 : vector<8x128xf32>
    %177 = arith.mulf %176, %15 : vector<8x128xf32>
    %178 = math.tanh %177 : vector<8x128xf32>
    %179 = arith.mulf %178, %18 : vector<8x128xf32>
    %180 = arith.addf %179, %21 : vector<8x128xf32>
    %181 = vector.extract_strided_slice %180 {offsets = [0, 0], sizes = [8, 32], strides = [1, 1]} : vector<8x128xf32> to vector<8x32xf32>
    %182 = vector.extract_strided_slice %180 {offsets = [0, 32], sizes = [8, 32], strides = [1, 1]} : vector<8x128xf32> to vector<8x32xf32>
    %183 = vector.extract_strided_slice %180 {offsets = [0, 64], sizes = [8, 32], strides = [1, 1]} : vector<8x128xf32> to vector<8x32xf32>
    %184 = vector.extract_strided_slice %180 {offsets = [0, 96], sizes = [8, 32], strides = [1, 1]} : vector<8x128xf32> to vector<8x32xf32>
    %185 = arith.mulf %182, %146 : vector<8x32xf32>
    %186 = arith.mulf %181, %183 : vector<8x32xf32>
    %187 = arith.addf %185, %186 : vector<8x32xf32>
    %188 = math.tanh %187 : vector<8x32xf32>
    %189 = arith.mulf %184, %188 : vector<8x32xf32>
    %c4_i32 = arith.constant 4 : i32
    %c8_i32_59 = arith.constant 8 : i32
    %190 = arith.muli %c4_i32, %c8_i32_59 : i32
    %191 = arith.index_cast %190 : i32 to index
    %c0_60 = arith.constant 0 : index
    %192 = vector.load %arg10[%191, %c0_60] : memref<64x128xf32, #tpu.memory_space<vmem>>, vector<8x128xf32>
    %193 = arith.truncf %168 : vector<8x32xf32> to vector<8x32xbf16>
    %c0_61 = arith.constant 0 : index
    %c0_62 = arith.constant 0 : index
    %194 = vector.load %arg2[%c0_61, %c0_62] : memref<32x128xbf16, #tpu.memory_space<vmem>>, vector<32x128xbf16>
    %cst_63 = arith.constant dense<0.000000e+00> : vector<8x128xf32>
    %195 = tpu.matmul %193, %194, %cst_63 {dimension_numbers = #tpu.dot_dimension_numbers<[1], [0], [0], [1], [0, 0, 1, 1], [], []>} : vector<8x32xbf16>, vector<32x128xbf16>, vector<8x128xf32> -> vector<8x128xf32>
    %196 = arith.addf %192, %195 : vector<8x128xf32>
    %197 = arith.mulf %196, %15 : vector<8x128xf32>
    %198 = math.tanh %197 : vector<8x128xf32>
    %199 = arith.mulf %198, %18 : vector<8x128xf32>
    %200 = arith.addf %199, %21 : vector<8x128xf32>
    %201 = vector.extract_strided_slice %200 {offsets = [0, 0], sizes = [8, 32], strides = [1, 1]} : vector<8x128xf32> to vector<8x32xf32>
    %202 = vector.extract_strided_slice %200 {offsets = [0, 32], sizes = [8, 32], strides = [1, 1]} : vector<8x128xf32> to vector<8x32xf32>
    %203 = vector.extract_strided_slice %200 {offsets = [0, 64], sizes = [8, 32], strides = [1, 1]} : vector<8x128xf32> to vector<8x32xf32>
    %204 = vector.extract_strided_slice %200 {offsets = [0, 96], sizes = [8, 32], strides = [1, 1]} : vector<8x128xf32> to vector<8x32xf32>
    %205 = arith.mulf %202, %166 : vector<8x32xf32>
    %206 = arith.mulf %201, %203 : vector<8x32xf32>
    %207 = arith.addf %205, %206 : vector<8x32xf32>
    %208 = math.tanh %207 : vector<8x32xf32>
    %209 = arith.mulf %204, %208 : vector<8x32xf32>
    %210 = arith.truncf %209 : vector<8x32xf32> to vector<8x32xbf16>
    %c0_64 = arith.constant 0 : index
    %c0_65 = arith.constant 0 : index
    %211 = vector.load %arg4[%c0_64, %c0_65] : memref<32x128xbf16, #tpu.memory_space<vmem>>, vector<32x128xbf16>
    %cst_66 = arith.constant dense<0.000000e+00> : vector<8x128xf32>
    %212 = tpu.matmul %210, %211, %cst_66 {dimension_numbers = #tpu.dot_dimension_numbers<[1], [0], [0], [1], [0, 0, 1, 1], [], []>} : vector<8x32xbf16>, vector<32x128xbf16>, vector<8x128xf32> -> vector<8x128xf32>
    %213 = arith.truncf %189 : vector<8x32xf32> to vector<8x32xbf16>
    %c0_67 = arith.constant 0 : index
    %c0_68 = arith.constant 0 : index
    %214 = vector.load %arg5[%c0_67, %c0_68] : memref<32x128xbf16, #tpu.memory_space<vmem>>, vector<32x128xbf16>
    %cst_69 = arith.constant dense<0.000000e+00> : vector<8x128xf32>
    %215 = tpu.matmul %213, %214, %cst_69 {dimension_numbers = #tpu.dot_dimension_numbers<[1], [0], [0], [1], [0, 0, 1, 1], [], []>} : vector<8x32xbf16>, vector<32x128xbf16>, vector<8x128xf32> -> vector<8x128xf32>
    %216 = arith.addf %212, %215 : vector<8x128xf32>
    %217 = arith.addf %216, %24 : vector<8x128xf32>
    %218 = arith.mulf %217, %15 : vector<8x128xf32>
    %219 = math.tanh %218 : vector<8x128xf32>
    %220 = arith.mulf %219, %18 : vector<8x128xf32>
    %221 = arith.addf %220, %21 : vector<8x128xf32>
    %222 = vector.extract_strided_slice %221 {offsets = [0, 0], sizes = [8, 32], strides = [1, 1]} : vector<8x128xf32> to vector<8x32xf32>
    %223 = vector.extract_strided_slice %221 {offsets = [0, 32], sizes = [8, 32], strides = [1, 1]} : vector<8x128xf32> to vector<8x32xf32>
    %224 = vector.extract_strided_slice %221 {offsets = [0, 64], sizes = [8, 32], strides = [1, 1]} : vector<8x128xf32> to vector<8x32xf32>
    %225 = vector.extract_strided_slice %221 {offsets = [0, 96], sizes = [8, 32], strides = [1, 1]} : vector<8x128xf32> to vector<8x32xf32>
    %226 = arith.mulf %223, %187 : vector<8x32xf32>
    %227 = arith.mulf %222, %224 : vector<8x32xf32>
    %228 = arith.addf %226, %227 : vector<8x32xf32>
    %229 = math.tanh %228 : vector<8x32xf32>
    %230 = arith.mulf %225, %229 : vector<8x32xf32>
    %c5_i32 = arith.constant 5 : i32
    %c8_i32_70 = arith.constant 8 : i32
    %231 = arith.muli %c5_i32, %c8_i32_70 : i32
    %232 = arith.index_cast %231 : i32 to index
    %c0_71 = arith.constant 0 : index
    %233 = vector.load %arg10[%232, %c0_71] : memref<64x128xf32, #tpu.memory_space<vmem>>, vector<8x128xf32>
    %234 = arith.truncf %209 : vector<8x32xf32> to vector<8x32xbf16>
    %c0_72 = arith.constant 0 : index
    %c0_73 = arith.constant 0 : index
    %235 = vector.load %arg2[%c0_72, %c0_73] : memref<32x128xbf16, #tpu.memory_space<vmem>>, vector<32x128xbf16>
    %cst_74 = arith.constant dense<0.000000e+00> : vector<8x128xf32>
    %236 = tpu.matmul %234, %235, %cst_74 {dimension_numbers = #tpu.dot_dimension_numbers<[1], [0], [0], [1], [0, 0, 1, 1], [], []>} : vector<8x32xbf16>, vector<32x128xbf16>, vector<8x128xf32> -> vector<8x128xf32>
    %237 = arith.addf %233, %236 : vector<8x128xf32>
    %238 = arith.mulf %237, %15 : vector<8x128xf32>
    %239 = math.tanh %238 : vector<8x128xf32>
    %240 = arith.mulf %239, %18 : vector<8x128xf32>
    %241 = arith.addf %240, %21 : vector<8x128xf32>
    %242 = vector.extract_strided_slice %241 {offsets = [0, 0], sizes = [8, 32], strides = [1, 1]} : vector<8x128xf32> to vector<8x32xf32>
    %243 = vector.extract_strided_slice %241 {offsets = [0, 32], sizes = [8, 32], strides = [1, 1]} : vector<8x128xf32> to vector<8x32xf32>
    %244 = vector.extract_strided_slice %241 {offsets = [0, 64], sizes = [8, 32], strides = [1, 1]} : vector<8x128xf32> to vector<8x32xf32>
    %245 = vector.extract_strided_slice %241 {offsets = [0, 96], sizes = [8, 32], strides = [1, 1]} : vector<8x128xf32> to vector<8x32xf32>
    %246 = arith.mulf %243, %207 : vector<8x32xf32>
    %247 = arith.mulf %242, %244 : vector<8x32xf32>
    %248 = arith.addf %246, %247 : vector<8x32xf32>
    %249 = math.tanh %248 : vector<8x32xf32>
    %250 = arith.mulf %245, %249 : vector<8x32xf32>
    %251 = arith.truncf %250 : vector<8x32xf32> to vector<8x32xbf16>
    %c0_75 = arith.constant 0 : index
    %c0_76 = arith.constant 0 : index
    %252 = vector.load %arg4[%c0_75, %c0_76] : memref<32x128xbf16, #tpu.memory_space<vmem>>, vector<32x128xbf16>
    %cst_77 = arith.constant dense<0.000000e+00> : vector<8x128xf32>
    %253 = tpu.matmul %251, %252, %cst_77 {dimension_numbers = #tpu.dot_dimension_numbers<[1], [0], [0], [1], [0, 0, 1, 1], [], []>} : vector<8x32xbf16>, vector<32x128xbf16>, vector<8x128xf32> -> vector<8x128xf32>
    %254 = arith.truncf %230 : vector<8x32xf32> to vector<8x32xbf16>
    %c0_78 = arith.constant 0 : index
    %c0_79 = arith.constant 0 : index
    %255 = vector.load %arg5[%c0_78, %c0_79] : memref<32x128xbf16, #tpu.memory_space<vmem>>, vector<32x128xbf16>
    %cst_80 = arith.constant dense<0.000000e+00> : vector<8x128xf32>
    %256 = tpu.matmul %254, %255, %cst_80 {dimension_numbers = #tpu.dot_dimension_numbers<[1], [0], [0], [1], [0, 0, 1, 1], [], []>} : vector<8x32xbf16>, vector<32x128xbf16>, vector<8x128xf32> -> vector<8x128xf32>
    %257 = arith.addf %253, %256 : vector<8x128xf32>
    %258 = arith.addf %257, %24 : vector<8x128xf32>
    %259 = arith.mulf %258, %15 : vector<8x128xf32>
    %260 = math.tanh %259 : vector<8x128xf32>
    %261 = arith.mulf %260, %18 : vector<8x128xf32>
    %262 = arith.addf %261, %21 : vector<8x128xf32>
    %263 = vector.extract_strided_slice %262 {offsets = [0, 0], sizes = [8, 32], strides = [1, 1]} : vector<8x128xf32> to vector<8x32xf32>
    %264 = vector.extract_strided_slice %262 {offsets = [0, 32], sizes = [8, 32], strides = [1, 1]} : vector<8x128xf32> to vector<8x32xf32>
    %265 = vector.extract_strided_slice %262 {offsets = [0, 64], sizes = [8, 32], strides = [1, 1]} : vector<8x128xf32> to vector<8x32xf32>
    %266 = vector.extract_strided_slice %262 {offsets = [0, 96], sizes = [8, 32], strides = [1, 1]} : vector<8x128xf32> to vector<8x32xf32>
    %267 = arith.mulf %264, %228 : vector<8x32xf32>
    %268 = arith.mulf %263, %265 : vector<8x32xf32>
    %269 = arith.addf %267, %268 : vector<8x32xf32>
    %270 = math.tanh %269 : vector<8x32xf32>
    %271 = arith.mulf %266, %270 : vector<8x32xf32>
    %c6_i32 = arith.constant 6 : i32
    %c8_i32_81 = arith.constant 8 : i32
    %272 = arith.muli %c6_i32, %c8_i32_81 : i32
    %273 = arith.index_cast %272 : i32 to index
    %c0_82 = arith.constant 0 : index
    %274 = vector.load %arg10[%273, %c0_82] : memref<64x128xf32, #tpu.memory_space<vmem>>, vector<8x128xf32>
    %275 = arith.truncf %250 : vector<8x32xf32> to vector<8x32xbf16>
    %c0_83 = arith.constant 0 : index
    %c0_84 = arith.constant 0 : index
    %276 = vector.load %arg2[%c0_83, %c0_84] : memref<32x128xbf16, #tpu.memory_space<vmem>>, vector<32x128xbf16>
    %cst_85 = arith.constant dense<0.000000e+00> : vector<8x128xf32>
    %277 = tpu.matmul %275, %276, %cst_85 {dimension_numbers = #tpu.dot_dimension_numbers<[1], [0], [0], [1], [0, 0, 1, 1], [], []>} : vector<8x32xbf16>, vector<32x128xbf16>, vector<8x128xf32> -> vector<8x128xf32>
    %278 = arith.addf %274, %277 : vector<8x128xf32>
    %279 = arith.mulf %278, %15 : vector<8x128xf32>
    %280 = math.tanh %279 : vector<8x128xf32>
    %281 = arith.mulf %280, %18 : vector<8x128xf32>
    %282 = arith.addf %281, %21 : vector<8x128xf32>
    %283 = vector.extract_strided_slice %282 {offsets = [0, 0], sizes = [8, 32], strides = [1, 1]} : vector<8x128xf32> to vector<8x32xf32>
    %284 = vector.extract_strided_slice %282 {offsets = [0, 32], sizes = [8, 32], strides = [1, 1]} : vector<8x128xf32> to vector<8x32xf32>
    %285 = vector.extract_strided_slice %282 {offsets = [0, 64], sizes = [8, 32], strides = [1, 1]} : vector<8x128xf32> to vector<8x32xf32>
    %286 = vector.extract_strided_slice %282 {offsets = [0, 96], sizes = [8, 32], strides = [1, 1]} : vector<8x128xf32> to vector<8x32xf32>
    %287 = arith.mulf %284, %248 : vector<8x32xf32>
    %288 = arith.mulf %283, %285 : vector<8x32xf32>
    %289 = arith.addf %287, %288 : vector<8x32xf32>
    %290 = math.tanh %289 : vector<8x32xf32>
    %291 = arith.mulf %286, %290 : vector<8x32xf32>
    %292 = arith.truncf %291 : vector<8x32xf32> to vector<8x32xbf16>
    %c0_86 = arith.constant 0 : index
    %c0_87 = arith.constant 0 : index
    %293 = vector.load %arg4[%c0_86, %c0_87] : memref<32x128xbf16, #tpu.memory_space<vmem>>, vector<32x128xbf16>
    %cst_88 = arith.constant dense<0.000000e+00> : vector<8x128xf32>
    %294 = tpu.matmul %292, %293, %cst_88 {dimension_numbers = #tpu.dot_dimension_numbers<[1], [0], [0], [1], [0, 0, 1, 1], [], []>} : vector<8x32xbf16>, vector<32x128xbf16>, vector<8x128xf32> -> vector<8x128xf32>
    %295 = arith.truncf %271 : vector<8x32xf32> to vector<8x32xbf16>
    %c0_89 = arith.constant 0 : index
    %c0_90 = arith.constant 0 : index
    %296 = vector.load %arg5[%c0_89, %c0_90] : memref<32x128xbf16, #tpu.memory_space<vmem>>, vector<32x128xbf16>
    %cst_91 = arith.constant dense<0.000000e+00> : vector<8x128xf32>
    %297 = tpu.matmul %295, %296, %cst_91 {dimension_numbers = #tpu.dot_dimension_numbers<[1], [0], [0], [1], [0, 0, 1, 1], [], []>} : vector<8x32xbf16>, vector<32x128xbf16>, vector<8x128xf32> -> vector<8x128xf32>
    %298 = arith.addf %294, %297 : vector<8x128xf32>
    %299 = arith.addf %298, %24 : vector<8x128xf32>
    %300 = arith.mulf %299, %15 : vector<8x128xf32>
    %301 = math.tanh %300 : vector<8x128xf32>
    %302 = arith.mulf %301, %18 : vector<8x128xf32>
    %303 = arith.addf %302, %21 : vector<8x128xf32>
    %304 = vector.extract_strided_slice %303 {offsets = [0, 0], sizes = [8, 32], strides = [1, 1]} : vector<8x128xf32> to vector<8x32xf32>
    %305 = vector.extract_strided_slice %303 {offsets = [0, 32], sizes = [8, 32], strides = [1, 1]} : vector<8x128xf32> to vector<8x32xf32>
    %306 = vector.extract_strided_slice %303 {offsets = [0, 64], sizes = [8, 32], strides = [1, 1]} : vector<8x128xf32> to vector<8x32xf32>
    %307 = vector.extract_strided_slice %303 {offsets = [0, 96], sizes = [8, 32], strides = [1, 1]} : vector<8x128xf32> to vector<8x32xf32>
    %308 = arith.mulf %305, %269 : vector<8x32xf32>
    %309 = arith.mulf %304, %306 : vector<8x32xf32>
    %310 = arith.addf %308, %309 : vector<8x32xf32>
    %311 = math.tanh %310 : vector<8x32xf32>
    %312 = arith.mulf %307, %311 : vector<8x32xf32>
    %c7_i32 = arith.constant 7 : i32
    %c8_i32_92 = arith.constant 8 : i32
    %313 = arith.muli %c7_i32, %c8_i32_92 : i32
    %314 = arith.index_cast %313 : i32 to index
    %c0_93 = arith.constant 0 : index
    %315 = vector.load %arg10[%314, %c0_93] : memref<64x128xf32, #tpu.memory_space<vmem>>, vector<8x128xf32>
    %316 = arith.truncf %291 : vector<8x32xf32> to vector<8x32xbf16>
    %c0_94 = arith.constant 0 : index
    %c0_95 = arith.constant 0 : index
    %317 = vector.load %arg2[%c0_94, %c0_95] : memref<32x128xbf16, #tpu.memory_space<vmem>>, vector<32x128xbf16>
    %cst_96 = arith.constant dense<0.000000e+00> : vector<8x128xf32>
    %318 = tpu.matmul %316, %317, %cst_96 {dimension_numbers = #tpu.dot_dimension_numbers<[1], [0], [0], [1], [0, 0, 1, 1], [], []>} : vector<8x32xbf16>, vector<32x128xbf16>, vector<8x128xf32> -> vector<8x128xf32>
    %319 = arith.addf %315, %318 : vector<8x128xf32>
    %320 = arith.mulf %319, %15 : vector<8x128xf32>
    %321 = math.tanh %320 : vector<8x128xf32>
    %322 = arith.mulf %321, %18 : vector<8x128xf32>
    %323 = arith.addf %322, %21 : vector<8x128xf32>
    %324 = vector.extract_strided_slice %323 {offsets = [0, 0], sizes = [8, 32], strides = [1, 1]} : vector<8x128xf32> to vector<8x32xf32>
    %325 = vector.extract_strided_slice %323 {offsets = [0, 32], sizes = [8, 32], strides = [1, 1]} : vector<8x128xf32> to vector<8x32xf32>
    %326 = vector.extract_strided_slice %323 {offsets = [0, 64], sizes = [8, 32], strides = [1, 1]} : vector<8x128xf32> to vector<8x32xf32>
    %327 = vector.extract_strided_slice %323 {offsets = [0, 96], sizes = [8, 32], strides = [1, 1]} : vector<8x128xf32> to vector<8x32xf32>
    %328 = arith.mulf %325, %289 : vector<8x32xf32>
    %329 = arith.mulf %324, %326 : vector<8x32xf32>
    %330 = arith.addf %328, %329 : vector<8x32xf32>
    %331 = math.tanh %330 : vector<8x32xf32>
    %332 = arith.mulf %327, %331 : vector<8x32xf32>
    %333 = arith.truncf %332 : vector<8x32xf32> to vector<8x32xbf16>
    %c0_97 = arith.constant 0 : index
    %c0_98 = arith.constant 0 : index
    %334 = vector.load %arg4[%c0_97, %c0_98] : memref<32x128xbf16, #tpu.memory_space<vmem>>, vector<32x128xbf16>
    %cst_99 = arith.constant dense<0.000000e+00> : vector<8x128xf32>
    %335 = tpu.matmul %333, %334, %cst_99 {dimension_numbers = #tpu.dot_dimension_numbers<[1], [0], [0], [1], [0, 0, 1, 1], [], []>} : vector<8x32xbf16>, vector<32x128xbf16>, vector<8x128xf32> -> vector<8x128xf32>
    %336 = arith.truncf %312 : vector<8x32xf32> to vector<8x32xbf16>
    %c0_100 = arith.constant 0 : index
    %c0_101 = arith.constant 0 : index
    %337 = vector.load %arg5[%c0_100, %c0_101] : memref<32x128xbf16, #tpu.memory_space<vmem>>, vector<32x128xbf16>
    %cst_102 = arith.constant dense<0.000000e+00> : vector<8x128xf32>
    %338 = tpu.matmul %336, %337, %cst_102 {dimension_numbers = #tpu.dot_dimension_numbers<[1], [0], [0], [1], [0, 0, 1, 1], [], []>} : vector<8x32xbf16>, vector<32x128xbf16>, vector<8x128xf32> -> vector<8x128xf32>
    %339 = arith.addf %335, %338 : vector<8x128xf32>
    %340 = arith.addf %339, %24 : vector<8x128xf32>
    %341 = arith.mulf %340, %15 : vector<8x128xf32>
    %342 = math.tanh %341 : vector<8x128xf32>
    %343 = arith.mulf %342, %18 : vector<8x128xf32>
    %344 = arith.addf %343, %21 : vector<8x128xf32>
    %345 = vector.extract_strided_slice %344 {offsets = [0, 0], sizes = [8, 32], strides = [1, 1]} : vector<8x128xf32> to vector<8x32xf32>
    %346 = vector.extract_strided_slice %344 {offsets = [0, 32], sizes = [8, 32], strides = [1, 1]} : vector<8x128xf32> to vector<8x32xf32>
    %347 = vector.extract_strided_slice %344 {offsets = [0, 64], sizes = [8, 32], strides = [1, 1]} : vector<8x128xf32> to vector<8x32xf32>
    %348 = vector.extract_strided_slice %344 {offsets = [0, 96], sizes = [8, 32], strides = [1, 1]} : vector<8x128xf32> to vector<8x32xf32>
    %349 = arith.mulf %346, %310 : vector<8x32xf32>
    %350 = arith.mulf %345, %347 : vector<8x32xf32>
    %351 = arith.addf %349, %350 : vector<8x32xf32>
    %352 = math.tanh %351 : vector<8x32xf32>
    %353 = arith.mulf %348, %352 : vector<8x32xf32>
    %c8_i32_103 = arith.constant 8 : i32
    %354 = arith.truncf %353 : vector<8x32xf32> to vector<8x32xbf16>
    %c0_104 = arith.constant 0 : index
    %c0_105 = arith.constant 0 : index
    %355 = vector.load %arg7[%c0_104, %c0_105] : memref<32x128xbf16, #tpu.memory_space<vmem>>, vector<32x128xbf16>
    %cst_106 = arith.constant dense<0.000000e+00> : vector<8x128xf32>
    %356 = tpu.matmul %354, %355, %cst_106 {dimension_numbers = #tpu.dot_dimension_numbers<[1], [0], [0], [1], [0, 0, 1, 1], [], []>} : vector<8x32xbf16>, vector<32x128xbf16>, vector<8x128xf32> -> vector<8x128xf32>
    %c0_107 = arith.constant 0 : index
    %c0_108 = arith.constant 0 : index
    %357 = vector.load %arg8[%c0_107, %c0_108] : memref<1x128xf32, #tpu.memory_space<vmem>>, vector<1x128xf32>
    %358 = vector.broadcast %357 : vector<1x128xf32> to vector<8x128xf32>
    %359 = arith.addf %356, %358 : vector<8x128xf32>
    %c0_109 = arith.constant 0 : index
    %c0_110 = arith.constant 0 : index
    %360 = vector.load %arg9[%c0_109, %c0_110] : memref<8x128xf32, #tpu.memory_space<vmem>>, vector<8x128xf32>
    tpu.vector_store %arg9[%c0_109, %c0_110], %359 {strides = array<i32>} : memref<8x128xf32, #tpu.memory_space<vmem>>, vector<8x128xf32>,
    return
  }
}

</mosaic_0001>

<bundles_post_ra>
// kernel: my_first_lstm_forward.1
= control target key start
LH: loop header
LB: loop body
LE: loop exit
PB: predicated region body
PF: predicated region fallthrough
CT: control target
= control target key end

     0   :  { %v2159_v1 = vmov 0.0   ;;  %vm2160_vm0 = vmmov 0   ;;  %vm84_vm1 = vcmask 261120   ;;  %v2161_v7 = vmov 0   ;;  %s2163_s22 = smov 64   ;;  %s2164_s23 = smov 32   ;;  %s2671_s1 = inlined_call_operand.vmem [shape: bf16[32,128], index: 1, kind: input, shape index: {}]   ;;  %s2672_s2 = inlined_call_operand.vmem [shape: bf16[32,128], index: 2, kind: input, shape index: {}]   ;;  %s2673_s0 = inlined_call_operand.vmem [shape: bf16[64,32], index: 0, kind: input, shape index: {}]   ;;  %s2674_s3 = inlined_call_operand.vmem [shape: f32[1,128], index: 3, kind: input, shape index: {}]   ;;  %s2675_s5 = inlined_call_operand.vmem [shape: bf16[32,128], index: 5, kind: input, shape index: {}]   ;;  %s2676_s4 = inlined_call_operand.vmem [shape: bf16[32,128], index: 4, kind: input, shape index: {}]   ;;  %s2677_s6 = inlined_call_operand.vmem [shape: f32[1,128], index: 6, kind: input, shape index: {}]   ;;  %s2678_s7 = inlined_call_operand.vmem [shape: bf16[32,128], index: 7, kind: input, shape index: {}]   ;;  %s2679_s8 = inlined_call_operand.vmem [shape: f32[1,128], index: 8, kind: input, shape index: {}]   ;;  %s2680_s9 = inlined_call_operand.vmem [shape: f32[8,128], index: 9, kind: output, shape index: {}]  }
   0x1   :  { %v2078_v0 = vld [vmem:[%s2671_s1] sm:$0xff]   ;;  %1872 = vmatprep.subr.bf16.mxu1 %v2159_v1  ;;  %1876 = vmatprep.mubr.msk.bf16.mxu1 %vm2160_vm0, %v2159_v1  ;;  %v2080_v3 = vld [vmem:[%s2671_s1 + $0x8] sm:$0xff]   ;;  %v170_v8 = vlaneseq  ;;  %v2162_v18 = vmov 0.5   ;;  %v2086_v33 = vld [vmem:[%s2673_s0 + $0x10] sm:$0xff]  }
   0x2   :  { %v2224_v2 = vld [vmem:[%s2672_s2] sm:$0xff]   ;;  %1860 = vmatprep.subr.bf16.mxu0 %v2078_v0  ;;  %v2233_v4 = vld [vmem:[%s2672_s2 + $0x8] sm:$0xff]   ;;  %v2088_v34 = vld [vmem:[%s2673_s0 + $0x18] sm:$0xff]  }
   0x3   :  { %1861 = vmatpush3.bf16.msra.mxu0 %v2078_v0  ;;  %1873 = vmatpush3.bf16.msra.mxu1 %v2224_v2  ;;  %v2082_v5 = vld [vmem:[%s2673_s0] sm:$0xff]   ;;  %v2083_v6 = vld [vmem:[%s2673_s0 + $0x8] sm:$0xff]   ;;  %v171_v9 = vand.u32 127, %v170_v8 }
   0x4   :  { %1862 = vmatprep.subr.bf16.mxu0 %v2080_v3  ;;  %1874 = vmatprep.subr.bf16.mxu1 %v2159_v1  ;;  %v2252_v10 = vld [vmem:[%s2674_s3] ss:$0 sm:$0xff]  ;;  %v2294_v37 = vld [vmem:[%s2675_s5 + $0x8] sm:$0xff]  }
   0x5   :  { %1864 = vmatprep.mubr.msk.bf16.mxu0 %vm84_vm1, %v2082_v5  ;;  %vm172_vm2 = vcmp.ge.s32.totalorder %v171_v9, 64  ;;  %vm173_vm3 = vcmp.lt.s32.totalorder %v171_v9, 96  ;;  %v2282_v35 = vld [vmem:[%s2675_s5] sm:$0xff]   ;;  %v2302_v38 = vld [vmem:[%s2676_s4 + $0x8] sm:$0xff]  }
   0x6   :  { %vm174_vm4 = vmand %vm172_vm2, %vm173_vm3  ;;  %v2287_v36 = vld [vmem:[%s2676_s4] sm:$0xff]  }
   0x7   :  { %1863 = vmatpush3.bf16.msra.mxu0 %v2080_v3  ;;  %1875 = vmatpush3.bf16.msra.mxu1 %v2233_v4  ;;  %v2259_v19 = vsel %vm174_vm4, 1.0, %v2162_v18  ;;  %v2264_v25 = vsel %vm174_vm4, 0.0, %v2162_v18  ;;  %v2346_v53 = vld [vmem:[%s2677_s6] ss:$0 sm:$0xff] }
   0x8   :  { %1880 = vmatprep.subr.bf16.mxu1 %v2159_v1  ;;  %1888 = vmatprep.subr.bf16.mxu0 %v2159_v1 }
   0xa   :  { %1865 = vmatmul.mubr.msk.bf16.vlgmr.msra.gmra.mrb[0].mxu0 %vm84_vm1, %v2083_v6  ;;  %1877 = vmatmul.mubr.bf16.vlgmr.msra.gmra.mrb[0].mxu1 %v2161_v7 }
   0xb   :  { %1884 = vmatprep.mubr.msk.bf16.mxu1 %vm2160_vm0, %v2159_v1  ;;  %1868 = vmatprep.mubr.msk.bf16.mxu0 %vm84_vm1, %v2086_v33 }
   0xc   :  { %1881 = vmatpush3.bf16.msra.mxu1 %v2282_v35  ;;  %1889 = vmatpush3.bf16.msra.mxu0 %v2287_v36 }
   0xd   :  { %1882 = vmatprep.subr.bf16.mxu1 %v2159_v1  ;;  %1890 = vmatprep.subr.bf16.mxu0 %v2159_v1 }
  0x10   :  { %1883 = vmatpush3.bf16.msra.mxu1 %v2294_v37  ;;  %1891 = vmatpush3.bf16.msra.mxu0 %v2302_v38 }
  0x11   :  { %1896 = vmatprep.subr.bf16.mxu1 %v2159_v1  ;;  %1904 = vmatprep.subr.bf16.mxu0 %v2159_v1 }
  0x12   :  { %1869 = vmatmul.mubr.msk.bf16.gmra.mrb[4].mxu0 %vm84_vm1, %v2088_v34 }
  0x13   :  { %1892 = vmatprep.mubr.msk.bf16.mxu0 %vm2160_vm0, %v2159_v1  ;;  %1885 = vmatmul.mubr.bf16.vlgmr.msra.gmra.mrb[4].mxu1 %v2161_v7 }
  0x14   :  { %1897 = vmatpush3.bf16.msra.mxu1 %v2224_v2  ;;  %1900 = vmatprep.mubr.msk.bf16.mxu1 %vm2160_vm0, %v2159_v1 }
  0x15   :  { %1898 = vmatprep.subr.bf16.mxu1 %v2159_v1 }
  0x18   :  { %1899 = vmatpush3.bf16.msra.mxu1 %v2233_v4 }
  0x19   :  { %1912 = vmatprep.subr.bf16.mxu1 %v2159_v1 }
  0xdd   :  { %v2254_v11 = vpop.f32.mrb[0].mxu0  ;;  %v238_v12 = vpop.f32.mrb[0].mxu1 }
  0xde   :  { %v131_v13 = vpop.f32.mrb[1].mxu0  ;;  %v1878_v14 = vpop.f32.mrb[1].mxu1 }
  0xdf   :  { %v132_v15 = vadd.f32 %v2252_v10, %v131_v13  ;;  %v2257_v16 = vpop.f32.mrb[2].mxu0  ;;  %v241_v17 = vpop.f32.mrb[2].mxu1 }
  0xe0   :  { %v2261_v20 = vpop.f32.mrb[3].mxu0  ;;  %v1879_v21 = vpop.f32.mrb[3].mxu1 }
  0xe1   :  { %v244_v22 = vadd.f32 %v238_v12, %v132_v15  ;;  %v135_v52 = vadd.f32 %v2252_v10, %v2261_v20 }
  0xe3   :  { %v245_v23 = vmul.f32 %v244_v22, %v2259_v19 }
  0xe5   :  { %2092 = vtanh.f32 %v245_v23  ;;  %v2319_v43 = vpop.f32.mrb[4].mxu0 }
  0xe6   :  { %v2321_v44 = vpop.f32.mrb[5].mxu0  ;;  %v321_v47 = vpop.f32.mrb[4].mxu1 }
  0xe7   :  { %v2323_v45 = vpop.f32.mrb[6].mxu0  ;;  %v1886_v48 = vpop.f32.mrb[5].mxu1 }
  0xe8   :  { %v2325_v46 = vpop.f32.mrb[7].mxu0  ;;  %v324_v49 = vpop.f32.mrb[6].mxu1 }
  0xe9   :  { %v1887_v50 = vpop.f32.mrb[7].mxu1 }
  0xef   :  { %v2093_v24 = vpop.eup %2092 }
  0xf0   :  { %v247_v26 = vmul.f32 %v2093_v24, %v2259_v19 }
  0xf2   :  { %v248_v27 = vadd.f32 %v247_v26, %v2264_v25 }
  0xf4   :  { %251 = vrot.lane.b32.xlu0 %v248_v27, %s2163_s22  ;;  %v249_v30 = vmul.f32 0.0, %v248_v27 }
 0x166   :  { %v252_v28 = vpop.permute.xlu0 %251 }
 0x167   :  { %v254_v29 = vmul.f32 %v252_v28, %v248_v27 }
 0x169   :  { %256 = vrot.lane.b32.xlu0 %v254_v29, %s2164_s23 }
 0x1db   :  { %v257_v31 = vpop.permute.xlu0 %256 }
 0x1dc   :  { %v2270_v32 = vadd.f32 %v257_v31, %v249_v30 }
 0x1de   :  { %2094 = vtanh.f32 %v2270_v32 }
 0x1e8   :  { %v2095_v39 = vpop.eup %2094 }
 0x1e9   :  { %262 = vrot.lane.b32.xlu1 %v2095_v39, %s2163_s22 }
 0x25b   :  { %v263_v40 = vpop.permute.xlu1 %262 }
 0x25c   :  { %v265_v41 = vmul.f32 %v263_v40, %v248_v27 }
 0x25e   :  { %v266_v42 = vpack.c.bf16 %v265_v41, %v265_v41 }
 0x260   :  { %328 = vrot.lane.b32.xlu1 %v266_v42, %s2164_s23 }
 0x2d2   :  { %v329_v51 = vpop.permute.xlu1 %328 }
 0x2d3   :  { %1893 = vmatmul.mubr.msk.bf16.vlgmr.msra.gmra.mrb[8].mxu0 %vm84_vm1, %v329_v51  ;;  %1901 = vmatmul.mubr.msk.bf16.vlgmr.msra.gmra.mrb[8].mxu1 %vm84_vm1, %v329_v51 }
 0x2d4   :  { %1913 = vmatpush3.bf16.msra.mxu1 %v2287_v36  ;;  %1905 = vmatpush3.bf16.msra.mxu0 %v2282_v35 }
 0x2d5   :  { %1914 = vmatprep.subr.bf16.mxu1 %v2159_v1  ;;  %1906 = vmatprep.subr.bf16.mxu0 %v2159_v1 }
 0x2d6   :  { %1916 = vmatprep.mubr.msk.bf16.mxu1 %vm2160_vm0, %v2159_v1  ;;  %1908 = vmatprep.mubr.msk.bf16.mxu0 %vm2160_vm0, %v2159_v1 }
 0x2d8   :  { %1915 = vmatpush3.bf16.msra.mxu1 %v2302_v38  ;;  %1907 = vmatpush3.bf16.msra.mxu0 %v2294_v37 }
 0x2d9   :  { %1920 = vmatprep.subr.bf16.mxu0 %v2159_v1  ;;  %1928 = vmatprep.subr.bf16.mxu1 %v2159_v1 }
 0x3a6   :  { %v379_v54 = vpop.f32.mrb[8].mxu0  ;;  %v442_v55 = vpop.f32.mrb[8].mxu1 }
 0x3a7   :  { %v380_v56 = vadd.f32 %v379_v54, %v321_v47  ;;  %v448_v57 = vadd.f32 %v442_v55, %v135_v52  ;;  %v1894_v58 = vpop.f32.mrb[9].mxu0  ;;  %v1902_v59 = vpop.f32.mrb[9].mxu1 }
 0x3a8   :  { %v382_v60 = vpop.f32.mrb[10].mxu0  ;;  %v445_v61 = vpop.f32.mrb[10].mxu1 }
 0x3a9   :  { %v385_v62 = vadd.f32 %v2346_v53, %v380_v56  ;;  %v449_v63 = vmul.f32 %v448_v57, %v2259_v19  ;;  %v1895_v0 = vpop.f32.mrb[11].mxu0  ;;  %v1903_v3 = vpop.f32.mrb[11].mxu1  ;;  %v140_v57 = vadd.f32 %v2254_v11, %v2252_v10 }
 0x3ab   :  { %v386_v5 = vmul.f32 %v385_v62, %v2259_v19  ;;  %2096 = vtanh.f32 %v449_v63 }
 0x3ad   :  { %2098 = vtanh.f32 %v386_v5 }
 0x3b5   :  { %v2097_v6 = vpop.eup %2096 }
 0x3b6   :  { %v451_v7 = vmul.f32 %v2097_v6, %v2259_v19 }
 0x3b7   :  { %v2099_v8 = vpop.eup %2098 }
 0x3b8   :  { %v452_v9 = vadd.f32 %v451_v7, %v2264_v25  ;;  %v388_v12 = vmul.f32 %v2099_v8, %v2259_v19 }
 0x3ba   :  { %455 = vrot.lane.b32.xlu1 %v452_v9, %s2163_s22  ;;  %v389_v13 = vadd.f32 %v388_v12, %v2264_v25  ;;  %v453_v20 = vmul.f32 %v452_v9, %v2270_v32 }
 0x3bc   :  { %392 = vrot.lane.b32.xlu0 %v389_v13, %s2163_s22  ;;  %v390_v23 = vmul.f32 0.0, %v389_v13 }
 0x42c   :  { %v456_v14 = vpop.permute.xlu1 %455 }
 0x42d   :  { %v458_v15 = vmul.f32 %v456_v14, %v452_v9 }
 0x42e   :  { %v393_v17 = vpop.permute.xlu0 %392 }
 0x42f   :  { %v395_v18 = vmul.f32 %v393_v17, %v389_v13  ;;  %460 = vrot.lane.b32.xlu1 %v458_v15, %s2164_s23 }
 0x431   :  { %397 = vrot.lane.b32.xlu0 %v395_v18, %s2164_s23 }
 0x4a1   :  { %v461_v21 = vpop.permute.xlu1 %460 }
 0x4a2   :  { %v2360_v22 = vadd.f32 %v461_v21, %v453_v20 }
 0x4a3   :  { %v398_v24 = vpop.permute.xlu0 %397 }
 0x4a4   :  { %2100 = vtanh.f32 %v2360_v22  ;;  %v2363_v26 = vadd.f32 %v398_v24, %v390_v23 }
 0x4a6   :  { %2102 = vtanh.f32 %v2363_v26 }
 0x4ae   :  { %v2101_v27 = vpop.eup %2100 }
 0x4af   :  { %466 = vrot.lane.b32.xlu1 %v2101_v27, %s2163_s22 }
 0x4b0   :  { %v2103_v28 = vpop.eup %2102 }
 0x4b1   :  { %403 = vrot.lane.b32.xlu0 %v2103_v28, %s2163_s22 }
 0x521   :  { %v467_v29 = vpop.permute.xlu1 %466 }
 0x522   :  { %v469_v30 = vmul.f32 %v467_v29, %v452_v9 }
 0x523   :  { %v404_v31 = vpop.permute.xlu0 %403 }
 0x524   :  { %v470_v32 = vpack.c.bf16 %v469_v30, %v469_v30  ;;  %v406_v33 = vmul.f32 %v404_v31, %v389_v13 }
 0x526   :  { %v471_v34 = vpack.c.bf16 %v406_v33, %v406_v33  ;;  %519 = vrot.lane.b32.xlu1 %v470_v32, %s2164_s23 }
 0x528   :  { %473 = vrot.lane.b32.xlu0 %v471_v34, %s2164_s23 }
 0x598   :  { %v520_v39 = vpop.permute.xlu1 %519 }
 0x599   :  { %1917 = vmatmul.mubr.msk.bf16.vlgmr.msra.gmra.mrb[12].mxu1 %vm84_vm1, %v520_v39 }
 0x59a   :  { %v474_v40 = vpop.permute.xlu0 %473  ;;  %1929 = vmatpush3.bf16.msra.mxu1 %v2282_v35  ;;  %1932 = vmatprep.mubr.msk.bf16.mxu1 %vm2160_vm0, %v2159_v1 }
 0x59b   :  { %1909 = vmatmul.mubr.msk.bf16.vlgmr.msra.gmra.mrb[12].mxu0 %vm84_vm1, %v474_v40  ;;  %1930 = vmatprep.subr.bf16.mxu1 %v2159_v1 }
 0x59c   :  { %1921 = vmatpush3.bf16.msra.mxu0 %v2224_v2  ;;  %1924 = vmatprep.mubr.msk.bf16.mxu0 %vm2160_vm0, %v2159_v1 }
 0x59d   :  { %1922 = vmatprep.subr.bf16.mxu0 %v2159_v1 }
 0x59e   :  { %1931 = vmatpush3.bf16.msra.mxu1 %v2294_v37 }
 0x59f   :  { %1944 = vmatprep.subr.bf16.mxu1 %v2159_v1 }
 0x5a0   :  { %1923 = vmatpush3.bf16.msra.mxu0 %v2233_v4 }
 0x5a1   :  { %1936 = vmatprep.subr.bf16.mxu0 %v2159_v1 }
 0x5a3   :  { %1925 = vmatmul.mubr.msk.bf16.vlgmr.msra.gmra.mrb[16].mxu0 %vm84_vm1, %v520_v39 }
 0x5a4   :  { %1937 = vmatpush3.bf16.msra.mxu0 %v2287_v36  ;;  %1940 = vmatprep.mubr.msk.bf16.mxu0 %vm2160_vm0, %v2159_v1 }
 0x5a5   :  { %1938 = vmatprep.subr.bf16.mxu0 %v2159_v1 }
 0x5a8   :  { %1939 = vmatpush3.bf16.msra.mxu0 %v2302_v38 }
 0x5a9   :  { %1952 = vmatprep.subr.bf16.mxu0 %v2159_v1 }
 0x66c   :  { %v558_v41 = vpop.f32.mrb[12].mxu1 }
 0x66d   :  { %v1918_v42 = vpop.f32.mrb[13].mxu1 }
 0x66e   :  { %v512_v47 = vpop.f32.mrb[12].mxu0  ;;  %v561_v48 = vpop.f32.mrb[14].mxu1  ;;  %v143_v42 = vadd.f32 %v2257_v16, %v2252_v10 }
 0x66f   :  { %v559_v49 = vadd.f32 %v558_v41, %v512_v47  ;;  %v1910_v50 = vpop.f32.mrb[13].mxu0  ;;  %v1919_v51 = vpop.f32.mrb[15].mxu1 }
 0x670   :  { %v515_v52 = vpop.f32.mrb[14].mxu0 }
 0x671   :  { %v564_v54 = vadd.f32 %v2346_v53, %v559_v49  ;;  %v1911_v55 = vpop.f32.mrb[15].mxu0 }
 0x673   :  { %v565_v56 = vmul.f32 %v564_v54, %v2259_v19 }
 0x675   :  { %2104 = vtanh.f32 %v565_v56 }
 0x676   :  { %v621_v58 = vpop.f32.mrb[16].mxu0 }
 0x677   :  { %v627_v59 = vadd.f32 %v621_v58, %v140_v57  ;;  %v1926_v60 = vpop.f32.mrb[17].mxu0 }
 0x678   :  { %v624_v61 = vpop.f32.mrb[18].mxu0 }
 0x679   :  { %v628_v62 = vmul.f32 %v627_v59, %v2259_v19  ;;  %v1927_v63 = vpop.f32.mrb[19].mxu0 }
 0x67b   :  { %2106 = vtanh.f32 %v628_v62 }
 0x67f   :  { %v2105_v0 = vpop.eup %2104 }
 0x680   :  { %v567_v3 = vmul.f32 %v2105_v0, %v2259_v19 }
 0x682   :  { %v568_v5 = vadd.f32 %v567_v3, %v2264_v25 }
 0x684   :  { %571 = vrot.lane.b32.xlu0 %v568_v5, %s2163_s22  ;;  %v569_v14 = vmul.f32 %v568_v5, %v2363_v26 }
 0x685   :  { %v2107_v6 = vpop.eup %2106 }
 0x686   :  { %v630_v7 = vmul.f32 %v2107_v6, %v2259_v19 }
 0x688   :  { %v631_v11 = vadd.f32 %v630_v7, %v2264_v25 }
 0x68a   :  { %634 = vrot.lane.b32.xlu1 %v631_v11, %s2163_s22  ;;  %v632_v18 = vmul.f32 %v631_v11, %v2360_v22 }
 0x6f6   :  { %v572_v8 = vpop.permute.xlu0 %571 }
 0x6f7   :  { %v574_v9 = vmul.f32 %v572_v8, %v568_v5 }
 0x6f9   :  { %576 = vrot.lane.b32.xlu0 %v574_v9, %s2164_s23 }
 0x6fc   :  { %v635_v12 = vpop.permute.xlu1 %634 }
 0x6fd   :  { %v637_v13 = vmul.f32 %v635_v12, %v631_v11 }
 0x6ff   :  { %639 = vrot.lane.b32.xlu1 %v637_v13, %s2164_s23 }
 0x76b   :  { %v577_v15 = vpop.permute.xlu0 %576 }
 0x76c   :  { %v2405_v17 = vadd.f32 %v577_v15, %v569_v14 }
 0x76e   :  { %2108 = vtanh.f32 %v2405_v17 }
 0x771   :  { %v640_v20 = vpop.permute.xlu1 %639 }
 0x772   :  { %v2409_v21 = vadd.f32 %v640_v20, %v632_v18 }
 0x774   :  { %2110 = vtanh.f32 %v2409_v21 }
 0x778   :  { %v2109_v23 = vpop.eup %2108 }
 0x779   :  { %582 = vrot.lane.b32.xlu0 %v2109_v23, %s2163_s22 }
 0x77e   :  { %v2111_v24 = vpop.eup %2110 }
 0x77f   :  { %645 = vrot.lane.b32.xlu1 %v2111_v24, %s2163_s22 }
 0x7eb   :  { %v583_v27 = vpop.permute.xlu0 %582 }
 0x7ec   :  { %v585_v26 = vmul.f32 %v583_v27, %v568_v5 }
 0x7ee   :  { %v650_v28 = vpack.c.bf16 %v585_v26, %v585_v26 }
 0x7f0   :  { %652 = vrot.lane.b32.xlu0 %v650_v28, %s2164_s23 }
 0x7f1   :  { %v646_v29 = vpop.permute.xlu1 %645 }
 0x7f2   :  { %v648_v30 = vmul.f32 %v646_v29, %v631_v11 }
 0x7f4   :  { %v649_v31 = vpack.c.bf16 %v648_v30, %v648_v30 }
 0x7f6   :  { %698 = vrot.lane.b32.xlu1 %v649_v31, %s2164_s23 }
 0x862   :  { %v653_v22 = vpop.permute.xlu0 %652 }
 0x863   :  { %1933 = vmatmul.mubr.msk.bf16.vlgmr.msra.gmra.mrb[16].mxu1 %vm84_vm1, %v653_v22 }
 0x864   :  { %1945 = vmatpush3.bf16.msra.mxu1 %v2224_v2  ;;  %1948 = vmatprep.mubr.msk.bf16.mxu1 %vm2160_vm0, %v2159_v1 }
 0x865   :  { %1946 = vmatprep.subr.bf16.mxu1 %v2159_v1 }
 0x868   :  { %1947 = vmatpush3.bf16.msra.mxu1 %v2233_v4  ;;  %v699_v32 = vpop.permute.xlu1 %698 }
 0x869   :  { %1941 = vmatmul.mubr.msk.bf16.vlgmr.msra.gmra.mrb[20].mxu0 %vm84_vm1, %v699_v32  ;;  %1960 = vmatprep.subr.bf16.mxu1 %v2159_v1 }
 0x86a   :  { %1953 = vmatpush3.bf16.msra.mxu0 %v2282_v35  ;;  %1956 = vmatprep.mubr.msk.bf16.mxu0 %vm2160_vm0, %v2159_v1 }
 0x86b   :  { %1949 = vmatmul.mubr.msk.bf16.vlgmr.msra.gmra.mrb[20].mxu1 %vm84_vm1, %v699_v32  ;;  %1954 = vmatprep.subr.bf16.mxu0 %v2159_v1 }
 0x86c   :  { %1961 = vmatpush3.bf16.msra.mxu1 %v2287_v36  ;;  %1964 = vmatprep.mubr.msk.bf16.mxu1 %vm2160_vm0, %v2159_v1 }
 0x86d   :  { %1962 = vmatprep.subr.bf16.mxu1 %v2159_v1 }
 0x86e   :  { %1955 = vmatpush3.bf16.msra.mxu0 %v2294_v37 }
 0x86f   :  { %1968 = vmatprep.subr.bf16.mxu0 %v2159_v1 }
 0x870   :  { %1963 = vmatpush3.bf16.msra.mxu1 %v2302_v38 }
 0x871   :  { %1976 = vmatprep.subr.bf16.mxu1 %v2159_v1 }
 0x936   :  { %v691_v33 = vpop.f32.mrb[16].mxu1 }
 0x937   :  { %v1934_v34 = vpop.f32.mrb[17].mxu1 }
 0x938   :  { %v694_v39 = vpop.f32.mrb[18].mxu1 }
 0x939   :  { %v1935_v40 = vpop.f32.mrb[19].mxu1 }
 0x93c   :  { %v737_v41 = vpop.f32.mrb[20].mxu0 }
 0x93d   :  { %v738_v47 = vadd.f32 %v737_v41, %v691_v33  ;;  %v1942_v48 = vpop.f32.mrb[21].mxu0 }
 0x93e   :  { %v740_v49 = vpop.f32.mrb[22].mxu0  ;;  %v800_v50 = vpop.f32.mrb[20].mxu1 }
 0x93f   :  { %v743_v51 = vadd.f32 %v2346_v53, %v738_v47  ;;  %v806_v52 = vadd.f32 %v800_v50, %v143_v42  ;;  %v1943_v54 = vpop.f32.mrb[23].mxu0  ;;  %v1950_v55 = vpop.f32.mrb[21].mxu1  ;;  %v148_v47 = vadd.f32 %v2252_v10, %v2321_v44 }
 0x940   :  { %v803_v56 = vpop.f32.mrb[22].mxu1 }
 0x941   :  { %v744_v57 = vmul.f32 %v743_v51, %v2259_v19  ;;  %v807_v58 = vmul.f32 %v806_v52, %v2259_v19  ;;  %v1951_v59 = vpop.f32.mrb[23].mxu1 }
 0x943   :  { %2112 = vtanh.f32 %v744_v57 }
 0x944   :  { %2114 = vtanh.f32 %v807_v58 }
 0x94d   :  { %v2113_v60 = vpop.eup %2112 }
 0x94e   :  { %v2115_v61 = vpop.eup %2114  ;;  %v746_v16 = vmul.f32 %v2113_v60, %v2259_v19 }
 0x94f   :  { %v809_v62 = vmul.f32 %v2115_v61, %v2259_v19 }
 0x950   :  { %v747_v63 = vadd.f32 %v746_v16, %v2264_v25 }
 0x951   :  { %v810_v0 = vadd.f32 %v809_v62, %v2264_v25 }
 0x952   :  { %750 = vrot.lane.b32.xlu0 %v747_v63, %s2163_s22  ;;  %v748_v11 = vmul.f32 %v747_v63, %v2405_v17 }
 0x953   :  { %813 = vrot.lane.b32.xlu1 %v810_v0, %s2163_s22  ;;  %v811_v8 = vmul.f32 %v810_v0, %v2409_v21 }
 0x9c4   :  { %v751_v3 = vpop.permute.xlu0 %750 }
 0x9c5   :  { %v814_v5 = vpop.permute.xlu1 %813  ;;  %v753_v6 = vmul.f32 %v751_v3, %v747_v63 }
 0x9c6   :  { %v816_v7 = vmul.f32 %v814_v5, %v810_v0 }
 0x9c7   :  { %755 = vrot.lane.b32.xlu0 %v753_v6, %s2164_s23 }
 0x9c8   :  { %818 = vrot.lane.b32.xlu1 %v816_v7, %s2164_s23 }
 0xa39   :  { %v756_v9 = vpop.permute.xlu0 %755 }
 0xa3a   :  { %v819_v12 = vpop.permute.xlu1 %818  ;;  %v2452_v13 = vadd.f32 %v756_v9, %v748_v11 }
 0xa3b   :  { %v2454_v14 = vadd.f32 %v819_v12, %v811_v8 }
 0xa3c   :  { %2116 = vtanh.f32 %v2452_v13 }
 0xa3d   :  { %2118 = vtanh.f32 %v2454_v14 }
 0xa46   :  { %v2117_v15 = vpop.eup %2116 }
 0xa47   :  { %v2119_v18 = vpop.eup %2118  ;;  %761 = vrot.lane.b32.xlu0 %v2117_v15, %s2163_s22 }
 0xa48   :  { %824 = vrot.lane.b32.xlu1 %v2119_v18, %s2163_s22 }
 0xab9   :  { %v762_v20 = vpop.permute.xlu0 %761 }
 0xaba   :  { %v825_v17 = vpop.permute.xlu1 %824  ;;  %v764_v23 = vmul.f32 %v762_v20, %v747_v63 }
 0xabb   :  { %v827_v21 = vmul.f32 %v825_v17, %v810_v0 }
 0xabc   :  { %v829_v24 = vpack.c.bf16 %v764_v23, %v764_v23 }
 0xabd   :  { %v828_v27 = vpack.c.bf16 %v827_v21, %v827_v21 }
 0xabe   :  { %831 = vrot.lane.b32.xlu0 %v829_v24, %s2164_s23 }
 0xabf   :  { %877 = vrot.lane.b32.xlu1 %v828_v27, %s2164_s23 }
 0xb30   :  { %v832_v26 = vpop.permute.xlu0 %831 }
 0xb31   :  { %v878_v28 = vpop.permute.xlu1 %877  ;;  %1957 = vmatmul.mubr.msk.bf16.vlgmr.msra.gmra.mrb[24].mxu0 %vm84_vm1, %v832_v26 }
 0xb32   :  { %1965 = vmatmul.mubr.msk.bf16.vlgmr.msra.gmra.mrb[24].mxu1 %vm84_vm1, %v878_v28  ;;  %1969 = vmatpush3.bf16.msra.mxu0 %v2224_v2 }
 0xb33   :  { %1970 = vmatprep.subr.bf16.mxu0 %v2159_v1  ;;  %1972 = vmatprep.mubr.msk.bf16.mxu0 %vm2160_vm0, %v2159_v1 }
 0xb34   :  { %1977 = vmatpush3.bf16.msra.mxu1 %v2282_v35  ;;  %1980 = vmatprep.mubr.msk.bf16.mxu1 %vm2160_vm0, %v2159_v1 }
 0xb35   :  { %1978 = vmatprep.subr.bf16.mxu1 %v2159_v1 }
 0xb36   :  { %1971 = vmatpush3.bf16.msra.mxu0 %v2233_v4 }
 0xb37   :  { %1984 = vmatprep.subr.bf16.mxu0 %v2159_v1 }
 0xb38   :  { %1979 = vmatpush3.bf16.msra.mxu1 %v2294_v37 }
 0xb39   :  { %1973 = vmatmul.mubr.msk.bf16.vlgmr.msra.gmra.mrb[28].mxu0 %vm84_vm1, %v878_v28  ;;  %1992 = vmatprep.subr.bf16.mxu1 %v2159_v1 }
 0xb3a   :  { %1985 = vmatpush3.bf16.msra.mxu0 %v2287_v36  ;;  %1988 = vmatprep.mubr.msk.bf16.mxu0 %vm2160_vm0, %v2159_v1 }
 0xb3b   :  { %1986 = vmatprep.subr.bf16.mxu0 %v2159_v1 }
 0xb3e   :  { %1987 = vmatpush3.bf16.msra.mxu0 %v2302_v38 }
 0xb3f   :  { %2000 = vmatprep.subr.bf16.mxu0 %v2159_v1 }
 0xc04   :  { %v870_v29 = vpop.f32.mrb[24].mxu0 }
 0xc05   :  { %v916_v30 = vpop.f32.mrb[24].mxu1  ;;  %v1958_v31 = vpop.f32.mrb[25].mxu0 }
 0xc06   :  { %v917_v22 = vadd.f32 %v916_v30, %v870_v29  ;;  %v1966_v32 = vpop.f32.mrb[25].mxu1  ;;  %v873_v33 = vpop.f32.mrb[26].mxu0  ;;  %v151_v30 = vadd.f32 %v2252_v10, %v2325_v46 }
 0xc07   :  { %v919_v34 = vpop.f32.mrb[26].mxu1  ;;  %v1959_v39 = vpop.f32.mrb[27].mxu0 }
 0xc08   :  { %v922_v40 = vadd.f32 %v2346_v53, %v917_v22  ;;  %v1967_v41 = vpop.f32.mrb[27].mxu1 }
 0xc0a   :  { %v923_v42 = vmul.f32 %v922_v40, %v2259_v19 }
 0xc0c   :  { %2120 = vtanh.f32 %v923_v42  ;;  %v979_v48 = vpop.f32.mrb[28].mxu0 }
 0xc0d   :  { %v985_v49 = vadd.f32 %v979_v48, %v148_v47  ;;  %v1974_v50 = vpop.f32.mrb[29].mxu0 }
 0xc0e   :  { %v982_v51 = vpop.f32.mrb[30].mxu0 }
 0xc0f   :  { %v986_v52 = vmul.f32 %v985_v49, %v2259_v19  ;;  %v1975_v54 = vpop.f32.mrb[31].mxu0 }
 0xc11   :  { %2122 = vtanh.f32 %v986_v52 }
 0xc16   :  { %v2121_v55 = vpop.eup %2120 }
 0xc17   :  { %v925_v56 = vmul.f32 %v2121_v55, %v2259_v19 }
 0xc19   :  { %v926_v57 = vadd.f32 %v925_v56, %v2264_v25 }
 0xc1b   :  { %v2123_v58 = vpop.eup %2122  ;;  %929 = vrot.lane.b32.xlu0 %v926_v57, %s2163_s22  ;;  %v927_v63 = vmul.f32 %v926_v57, %v2452_v13 }
 0xc1c   :  { %v988_v59 = vmul.f32 %v2123_v58, %v2259_v19 }
 0xc1e   :  { %v989_v44 = vadd.f32 %v988_v59, %v2264_v25 }
 0xc20   :  { %992 = vrot.lane.b32.xlu1 %v989_v44, %s2163_s22  ;;  %v990_v5 = vmul.f32 %v989_v44, %v2454_v14 }
 0xc8d   :  { %v930_v60 = vpop.permute.xlu0 %929 }
 0xc8e   :  { %v932_v61 = vmul.f32 %v930_v60, %v926_v57 }
 0xc90   :  { %934 = vrot.lane.b32.xlu0 %v932_v61, %s2164_s23 }
 0xc92   :  { %v993_v16 = vpop.permute.xlu1 %992 }
 0xc93   :  { %v995_v62 = vmul.f32 %v993_v16, %v989_v44 }
 0xc95   :  { %997 = vrot.lane.b32.xlu1 %v995_v62, %s2164_s23 }
 0xd02   :  { %v935_v0 = vpop.permute.xlu0 %934 }
 0xd03   :  { %v2497_v3 = vadd.f32 %v935_v0, %v927_v63 }
 0xd05   :  { %2124 = vtanh.f32 %v2497_v3 }
 0xd07   :  { %v998_v6 = vpop.permute.xlu1 %997 }
 0xd08   :  { %v2501_v7 = vadd.f32 %v998_v6, %v990_v5 }
 0xd0a   :  { %2126 = vtanh.f32 %v2501_v7 }
 0xd0f   :  { %v2125_v11 = vpop.eup %2124 }
 0xd10   :  { %940 = vrot.lane.b32.xlu0 %v2125_v11, %s2163_s22 }
 0xd14   :  { %v2127_v8 = vpop.eup %2126 }
 0xd15   :  { %1003 = vrot.lane.b32.xlu1 %v2127_v8, %s2163_s22 }
 0xd82   :  { %v941_v9 = vpop.permute.xlu0 %940 }
 0xd83   :  { %v943_v12 = vmul.f32 %v941_v9, %v926_v57 }
 0xd85   :  { %v1008_v13 = vpack.c.bf16 %v943_v12, %v943_v12 }
 0xd87   :  { %1010 = vrot.lane.b32.xlu0 %v1008_v13, %s2164_s23  ;;  %v1004_v15 = vpop.permute.xlu1 %1003 }
 0xd88   :  { %v1006_v18 = vmul.f32 %v1004_v15, %v989_v44 }
 0xd8a   :  { %v1007_v20 = vpack.c.bf16 %v1006_v18, %v1006_v18 }
 0xd8c   :  { %1056 = vrot.lane.b32.xlu1 %v1007_v20, %s2164_s23 }
 0xdf9   :  { %v1011_v14 = vpop.permute.xlu0 %1010 }
 0xdfa   :  { %1981 = vmatmul.mubr.msk.bf16.vlgmr.msra.gmra.mrb[28].mxu1 %vm84_vm1, %v1011_v14 }
 0xdfb   :  { %1993 = vmatpush3.bf16.msra.mxu1 %v2224_v2  ;;  %1996 = vmatprep.mubr.msk.bf16.mxu1 %vm2160_vm0, %v2159_v1 }
 0xdfc   :  { %1994 = vmatprep.subr.bf16.mxu1 %v2159_v1 }
 0xdfe   :  { %v1057_v17 = vpop.permute.xlu1 %1056 }
 0xdff   :  { %1995 = vmatpush3.bf16.msra.mxu1 %v2233_v4  ;;  %1989 = vmatmul.mubr.msk.bf16.vlgmr.msra.gmra.mrb[32].mxu0 %vm84_vm1, %v1057_v17 }
 0xe00   :  { %2008 = vmatprep.subr.bf16.mxu1 %v2159_v1  ;;  %2001 = vmatpush3.bf16.msra.mxu0 %v2282_v35 }
 0xe01   :  { %2002 = vmatprep.subr.bf16.mxu0 %v2159_v1  ;;  %2004 = vmatprep.mubr.msk.bf16.mxu0 %vm2160_vm0, %v2159_v1 }
 0xe02   :  { %1997 = vmatmul.mubr.msk.bf16.vlgmr.msra.gmra.mrb[32].mxu1 %vm84_vm1, %v1057_v17 }
 0xe03   :  { %2009 = vmatpush3.bf16.msra.mxu1 %v2287_v36  ;;  %2012 = vmatprep.mubr.msk.bf16.mxu1 %vm2160_vm0, %v2159_v1 }
 0xe04   :  { %2010 = vmatprep.subr.bf16.mxu1 %v2159_v1  ;;  %2003 = vmatpush3.bf16.msra.mxu0 %v2294_v37 }
 0xe05   :  { %2016 = vmatprep.subr.bf16.mxu0 %v2159_v1 }
 0xe07   :  { %2011 = vmatpush3.bf16.msra.mxu1 %v2302_v38 }
 0xe08   :  { %2024 = vmatprep.subr.bf16.mxu1 %v2159_v1 }
 0xecd   :  { %v1049_v23 = vpop.f32.mrb[28].mxu1 }
 0xece   :  { %v1982_v21 = vpop.f32.mrb[29].mxu1 }
 0xecf   :  { %v1052_v24 = vpop.f32.mrb[30].mxu1 }
 0xed0   :  { %v1983_v27 = vpop.f32.mrb[31].mxu1  ;;  %v156_v24 = vadd.f32 %v2319_v43, %v2252_v10 }
 0xed2   :  { %v1095_v26 = vpop.f32.mrb[32].mxu0 }
 0xed3   :  { %v1096_v28 = vadd.f32 %v1095_v26, %v1049_v23  ;;  %v1990_v29 = vpop.f32.mrb[33].mxu0 }
 0xed4   :  { %v1098_v31 = vpop.f32.mrb[34].mxu0 }
 0xed5   :  { %v1101_v22 = vadd.f32 %v2346_v53, %v1096_v28  ;;  %v1158_v32 = vpop.f32.mrb[32].mxu1  ;;  %v1991_v33 = vpop.f32.mrb[35].mxu0 }
 0xed6   :  { %v1164_v34 = vadd.f32 %v1158_v32, %v151_v30  ;;  %v1998_v39 = vpop.f32.mrb[33].mxu1 }
 0xed7   :  { %v1102_v40 = vmul.f32 %v1101_v22, %v2259_v19  ;;  %v1161_v41 = vpop.f32.mrb[34].mxu1 }
 0xed8   :  { %v1165_v42 = vmul.f32 %v1164_v34, %v2259_v19  ;;  %v1999_v47 = vpop.f32.mrb[35].mxu1 }
 0xed9   :  { %2128 = vtanh.f32 %v1102_v40 }
 0xeda   :  { %2130 = vtanh.f32 %v1165_v42 }
 0xee3   :  { %v2129_v48 = vpop.eup %2128 }
 0xee4   :  { %v2131_v49 = vpop.eup %2130  ;;  %v1104_v50 = vmul.f32 %v2129_v48, %v2259_v19 }
 0xee5   :  { %v1167_v46 = vmul.f32 %v2131_v49, %v2259_v19 }
 0xee6   :  { %v1105_v51 = vadd.f32 %v1104_v50, %v2264_v25 }
 0xee7   :  { %v1168_v52 = vadd.f32 %v1167_v46, %v2264_v25 }
 0xee8   :  { %1108 = vrot.lane.b32.xlu0 %v1105_v51, %s2163_s22  ;;  %v1106_v58 = vmul.f32 %v1105_v51, %v2497_v3 }
 0xee9   :  { %1171 = vrot.lane.b32.xlu1 %v1168_v52, %s2163_s22  ;;  %v1169_v59 = vmul.f32 %v1168_v52, %v2501_v7 }
 0xf5a   :  { %v1109_v54 = vpop.permute.xlu0 %1108 }
 0xf5b   :  { %v1172_v55 = vpop.permute.xlu1 %1171  ;;  %v1111_v56 = vmul.f32 %v1109_v54, %v1105_v51 }
 0xf5c   :  { %v1174_v57 = vmul.f32 %v1172_v55, %v1168_v52 }
 0xf5d   :  { %1113 = vrot.lane.b32.xlu0 %v1111_v56, %s2164_s23 }
 0xf5e   :  { %1176 = vrot.lane.b32.xlu1 %v1174_v57, %s2164_s23 }
 0xfcf   :  { %v1114_v44 = vpop.permute.xlu0 %1113 }
 0xfd0   :  { %v1177_v60 = vpop.permute.xlu1 %1176  ;;  %v2544_v61 = vadd.f32 %v1114_v44, %v1106_v58 }
 0xfd1   :  { %v2546_v16 = vadd.f32 %v1177_v60, %v1169_v59 }
 0xfd2   :  { %2132 = vtanh.f32 %v2544_v61 }
 0xfd3   :  { %2134 = vtanh.f32 %v2546_v16 }
 0xfdc   :  { %v2133_v62 = vpop.eup %2132 }
 0xfdd   :  { %v2135_v63 = vpop.eup %2134  ;;  %1119 = vrot.lane.b32.xlu0 %v2133_v62, %s2163_s22  ;;  %v2157_v62 = vld [vmem:[%s2672_s2 + $0x8] sm:$0xff]  }
 0xfde   :  { %1182 = vrot.lane.b32.xlu1 %v2135_v63, %s2163_s22 }
0x104f   :  { %v1120_v0 = vpop.permute.xlu0 %1119 }
0x1050   :  { %v1183_v3 = vpop.permute.xlu1 %1182  ;;  %v1122_v5 = vmul.f32 %v1120_v0, %v1105_v51 }
0x1051   :  { %v1185_v6 = vmul.f32 %v1183_v3, %v1168_v52 }
0x1052   :  { %v1187_v7 = vpack.c.bf16 %v1122_v5, %v1122_v5 }
0x1053   :  { %v1186_v11 = vpack.c.bf16 %v1185_v6, %v1185_v6 }
0x1054   :  { %1189 = vrot.lane.b32.xlu0 %v1187_v7, %s2164_s23 }
0x1055   :  { %1235 = vrot.lane.b32.xlu1 %v1186_v11, %s2164_s23 }
0x10c6   :  { %v1190_v8 = vpop.permute.xlu0 %1189 }
0x10c7   :  { %v1236_v9 = vpop.permute.xlu1 %1235  ;;  %2005 = vmatmul.mubr.msk.bf16.vlgmr.msra.gmra.mrb[36].mxu0 %vm84_vm1, %v1190_v8 }
0x10c8   :  { %2013 = vmatmul.mubr.msk.bf16.vlgmr.msra.gmra.mrb[36].mxu1 %vm84_vm1, %v1236_v9  ;;  %2017 = vmatpush3.bf16.msra.mxu0 %v2224_v2 }
0x10c9   :  { %2018 = vmatprep.subr.bf16.mxu0 %v2159_v1  ;;  %2020 = vmatprep.mubr.msk.bf16.mxu0 %vm2160_vm0, %v2159_v1 }
0x10ca   :  { %2025 = vmatpush3.bf16.msra.mxu1 %v2282_v35  ;;  %2028 = vmatprep.mubr.msk.bf16.mxu1 %vm2160_vm0, %v2159_v1 }
0x10cb   :  { %2026 = vmatprep.subr.bf16.mxu1 %v2159_v1 }
0x10cc   :  { %2019 = vmatpush3.bf16.msra.mxu0 %v2233_v4 }
0x10cd   :  { %2032 = vmatprep.subr.bf16.mxu0 %v2159_v1 }
0x10ce   :  { %2027 = vmatpush3.bf16.msra.mxu1 %v2294_v37 }
0x10cf   :  { %2021 = vmatmul.mubr.msk.bf16.vlgmr.msra.gmra.mrb[40].mxu0 %vm84_vm1, %v1236_v9  ;;  %2040 = vmatprep.subr.bf16.mxu1 %v2159_v1 }
0x10d0   :  { %2033 = vmatpush3.bf16.msra.mxu0 %v2287_v36  ;;  %2036 = vmatprep.mubr.msk.bf16.mxu0 %vm2160_vm0, %v2159_v1 }
0x10d1   :  { %2034 = vmatprep.subr.bf16.mxu0 %v2159_v1 }
0x10d4   :  { %2035 = vmatpush3.bf16.msra.mxu0 %v2302_v38 }
0x10d5   :  { %2048 = vmatprep.subr.bf16.mxu0 %v2159_v1 }
0x119a   :  { %v1228_v2 = vpop.f32.mrb[36].mxu0 }
0x119b   :  { %v1274_v4 = vpop.f32.mrb[36].mxu1  ;;  %v2006_v12 = vpop.f32.mrb[37].mxu0 }
0x119c   :  { %v1275_v13 = vadd.f32 %v1274_v4, %v1228_v2  ;;  %v2014_v15 = vpop.f32.mrb[37].mxu1  ;;  %v1231_v18 = vpop.f32.mrb[38].mxu0 }
0x119d   :  { %v1277_v20 = vpop.f32.mrb[38].mxu1  ;;  %v2007_v14 = vpop.f32.mrb[39].mxu0 }
0x119e   :  { %v1280_v17 = vadd.f32 %v2346_v53, %v1275_v13  ;;  %v2015_v23 = vpop.f32.mrb[39].mxu1 }
0x11a0   :  { %v1281_v21 = vmul.f32 %v1280_v17, %v2259_v19 }
0x11a2   :  { %2136 = vtanh.f32 %v1281_v21  ;;  %v1337_v27 = vpop.f32.mrb[40].mxu0 }
0x11a3   :  { %v1343_v26 = vadd.f32 %v1337_v27, %v156_v24  ;;  %v2022_v28 = vpop.f32.mrb[41].mxu0 }
0x11a4   :  { %v1340_v29 = vpop.f32.mrb[42].mxu0 }
0x11a5   :  { %v1344_v30 = vmul.f32 %v1343_v26, %v2259_v19  ;;  %v2023_v31 = vpop.f32.mrb[43].mxu0 }
0x11a7   :  { %2138 = vtanh.f32 %v1344_v30 }
0x11ac   :  { %v2137_v22 = vpop.eup %2136 }
0x11ad   :  { %v1283_v32 = vmul.f32 %v2137_v22, %v2259_v19 }
0x11af   :  { %v1284_v33 = vadd.f32 %v1283_v32, %v2264_v25 }
0x11b1   :  { %v2139_v34 = vpop.eup %2138  ;;  %1287 = vrot.lane.b32.xlu0 %v1284_v33, %s2163_s22  ;;  %v1285_v47 = vmul.f32 %v1284_v33, %v2544_v61  ;;  %v2156_v61 = vld [vmem:[%s2672_s2] sm:$0xff]  }
0x11b2   :  { %v1346_v39 = vmul.f32 %v2139_v34, %v2259_v19 }
0x11b4   :  { %v1347_v10 = vadd.f32 %v1346_v39, %v2264_v25 }
0x11b6   :  { %1350 = vrot.lane.b32.xlu1 %v1347_v10, %s2163_s22  ;;  %v1348_v50 = vmul.f32 %v1347_v10, %v2546_v16 }
0x1223   :  { %v1288_v43 = vpop.permute.xlu0 %1287 }
0x1224   :  { %v1290_v40 = vmul.f32 %v1288_v43, %v1284_v33 }
0x1226   :  { %1292 = vrot.lane.b32.xlu0 %v1290_v40, %s2164_s23 }
0x1228   :  { %v1351_v41 = vpop.permute.xlu1 %1350 }
0x1229   :  { %v1353_v42 = vmul.f32 %v1351_v41, %v1347_v10 }
0x122b   :  { %1355 = vrot.lane.b32.xlu1 %v1353_v42, %s2164_s23 }
0x1298   :  { %v1293_v48 = vpop.permute.xlu0 %1292 }
0x1299   :  { %v2589_v49 = vadd.f32 %v1293_v48, %v1285_v47 }
0x129b   :  { %2140 = vtanh.f32 %v2589_v49 }
0x129d   :  { %v1356_v46 = vpop.permute.xlu1 %1355 }
0x129e   :  { %v2593_v51 = vadd.f32 %v1356_v46, %v1348_v50 }
0x12a0   :  { %2142 = vtanh.f32 %v2593_v51 }
0x12a5   :  { %v2141_v52 = vpop.eup %2140 }
0x12a6   :  { %1298 = vrot.lane.b32.xlu0 %v2141_v52, %s2163_s22 }
0x12aa   :  { %v2143_v54 = vpop.eup %2142 }
0x12ab   :  { %1361 = vrot.lane.b32.xlu1 %v2143_v54, %s2163_s22 }
0x1318   :  { %v1299_v55 = vpop.permute.xlu0 %1298 }
0x1319   :  { %v1301_v56 = vmul.f32 %v1299_v55, %v1284_v33 }
0x131b   :  { %v1366_v57 = vpack.c.bf16 %v1301_v56, %v1301_v56 }
0x131d   :  { %1368 = vrot.lane.b32.xlu0 %v1366_v57, %s2164_s23  ;;  %v1362_v58 = vpop.permute.xlu1 %1361 }
0x131e   :  { %v1364_v59 = vmul.f32 %v1362_v58, %v1347_v10 }
0x1320   :  { %v1365_v44 = vpack.c.bf16 %v1364_v59, %v1364_v59 }
0x1322   :  { %1414 = vrot.lane.b32.xlu1 %v1365_v44, %s2164_s23 }
0x138f   :  { %v1369_v60 = vpop.permute.xlu0 %1368 }
0x1390   :  { %2029 = vmatmul.mubr.msk.bf16.vlgmr.msra.gmra.mrb[40].mxu1 %vm84_vm1, %v1369_v60 }
0x1391   :  { %2041 = vmatpush3.bf16.msra.mxu1 %v2156_v61  ;;  %2044 = vmatprep.mubr.msk.bf16.mxu1 %vm2160_vm0, %v2159_v1 }
0x1392   :  { %2042 = vmatprep.subr.bf16.mxu1 %v2159_v1 }
0x1394   :  { %v1415_v16 = vpop.permute.xlu1 %1414 }
0x1395   :  { %2043 = vmatpush3.bf16.msra.mxu1 %v2157_v62  ;;  %2037 = vmatmul.mubr.msk.bf16.vlgmr.msra.gmra.mrb[44].mxu0 %vm84_vm1, %v1415_v16 }
0x1396   :  { %2056 = vmatprep.subr.bf16.mxu1 %v2159_v1  ;;  %2049 = vmatpush3.bf16.msra.mxu0 %v2282_v35 }
0x1397   :  { %2050 = vmatprep.subr.bf16.mxu0 %v2159_v1  ;;  %2052 = vmatprep.mubr.msk.bf16.mxu0 %vm2160_vm0, %v2159_v1 }
0x1398   :  { %2045 = vmatmul.mubr.msk.bf16.vlgmr.msra.gmra.mrb[44].mxu1 %vm84_vm1, %v1415_v16 }
0x1399   :  { %2057 = vmatpush3.bf16.msra.mxu1 %v2287_v36  ;;  %2060 = vmatprep.mubr.msk.bf16.mxu1 %vm2160_vm0, %v2159_v1  ;;  %v2158_v36 = vld [vmem:[%s2674_s3] ss:$0 sm:$0xff] }
0x139a   :  { %2058 = vmatprep.subr.bf16.mxu1 %v2159_v1  ;;  %2051 = vmatpush3.bf16.msra.mxu0 %v2294_v37  ;;  %v159_v11 = vadd.f32 %v2158_v36, %v2323_v45 }
0x139b   :  { %2064 = vmatprep.subr.bf16.mxu0 %v2159_v1 }
0x139d   :  { %2059 = vmatpush3.bf16.msra.mxu1 %v2302_v38 }
0x1463   :  { %v1407_v35 = vpop.f32.mrb[40].mxu1 }
0x1464   :  { %v2030_v63 = vpop.f32.mrb[41].mxu1 }
0x1465   :  { %v1410_v0 = vpop.f32.mrb[42].mxu1 }
0x1466   :  { %v2031_v3 = vpop.f32.mrb[43].mxu1 }
0x1468   :  { %v1453_v5 = vpop.f32.mrb[44].mxu0 }
0x1469   :  { %v1454_v6 = vadd.f32 %v1453_v5, %v1407_v35  ;;  %v2038_v7 = vpop.f32.mrb[45].mxu0 }
0x146a   :  { %v1456_v8 = vpop.f32.mrb[46].mxu0 }
0x146b   :  { %v1459_v37 = vadd.f32 %v2346_v53, %v1454_v6  ;;  %v1516_v9 = vpop.f32.mrb[44].mxu1  ;;  %v2039_v2 = vpop.f32.mrb[47].mxu0 }
0x146c   :  { %v1522_v4 = vadd.f32 %v1516_v9, %v159_v11  ;;  %v2046_v38 = vpop.f32.mrb[45].mxu1  ;;  %v1775_v11 = vld [vmem:[%s2679_s8] ss:$0 sm:$0xff] }
0x146d   :  { %v1460_v12 = vmul.f32 %v1459_v37, %v2259_v19  ;;  %v1519_v13 = vpop.f32.mrb[46].mxu1 }
0x146e   :  { %v1523_v15 = vmul.f32 %v1522_v4, %v2259_v19  ;;  %v2047_v18 = vpop.f32.mrb[47].mxu1 }
0x146f   :  { %2144 = vtanh.f32 %v1460_v12 }
0x1470   :  { %2146 = vtanh.f32 %v1523_v15 }
0x1479   :  { %v2145_v20 = vpop.eup %2144 }
0x147a   :  { %v2147_v14 = vpop.eup %2146  ;;  %v1462_v17 = vmul.f32 %v2145_v20, %v2259_v19 }
0x147b   :  { %v1525_v45 = vmul.f32 %v2147_v14, %v2259_v19 }
0x147c   :  { %v1463_v23 = vadd.f32 %v1462_v17, %v2264_v25 }
0x147d   :  { %v1526_v21 = vadd.f32 %v1525_v45, %v2264_v25 }
0x147e   :  { %1466 = vrot.lane.b32.xlu0 %v1463_v23, %s2163_s22  ;;  %v1464_v29 = vmul.f32 %v1463_v23, %v2589_v49 }
0x147f   :  { %1529 = vrot.lane.b32.xlu1 %v1526_v21, %s2163_s22  ;;  %v1527_v30 = vmul.f32 %v1526_v21, %v2593_v51 }
0x14f0   :  { %v1467_v24 = vpop.permute.xlu0 %1466 }
0x14f1   :  { %v1530_v27 = vpop.permute.xlu1 %1529  ;;  %v1469_v26 = vmul.f32 %v1467_v24, %v1463_v23 }
0x14f2   :  { %v1532_v28 = vmul.f32 %v1530_v27, %v1526_v21 }
0x14f3   :  { %1471 = vrot.lane.b32.xlu0 %v1469_v26, %s2164_s23 }
0x14f4   :  { %1534 = vrot.lane.b32.xlu1 %v1532_v28, %s2164_s23 }
0x1565   :  { %v1472_v31 = vpop.permute.xlu0 %1471 }
0x1566   :  { %v1535_v22 = vpop.permute.xlu1 %1534  ;;  %v1474_v32 = vadd.f32 %v1472_v31, %v1464_v29 }
0x1567   :  { %v1537_v33 = vadd.f32 %v1535_v22, %v1527_v30 }
0x1568   :  { %2148 = vtanh.f32 %v1474_v32 }
0x1569   :  { %2150 = vtanh.f32 %v1537_v33 }
0x1572   :  { %v2149_v34 = vpop.eup %2148 }
0x1573   :  { %v2151_v39 = vpop.eup %2150  ;;  %1477 = vrot.lane.b32.xlu0 %v2149_v34, %s2163_s22 }
0x1574   :  { %1540 = vrot.lane.b32.xlu1 %v2151_v39, %s2163_s22 }
0x15e5   :  { %v1478_v10 = vpop.permute.xlu0 %1477 }
0x15e6   :  { %v1541_v43 = vpop.permute.xlu1 %1540  ;;  %v1480_v40 = vmul.f32 %v1478_v10, %v1463_v23 }
0x15e7   :  { %v1543_v41 = vmul.f32 %v1541_v43, %v1526_v21 }
0x15e8   :  { %v1545_v42 = vpack.c.bf16 %v1480_v40, %v1480_v40 }
0x15e9   :  { %v1544_v47 = vpack.c.bf16 %v1543_v41, %v1543_v41 }
0x15ea   :  { %1547 = vrot.lane.b32.xlu0 %v1545_v42, %s2164_s23 }
0x15eb   :  { %1593 = vrot.lane.b32.xlu1 %v1544_v47, %s2164_s23 }
0x165c   :  { %v1548_v48 = vpop.permute.xlu0 %1547 }
0x165d   :  { %v1594_v49 = vpop.permute.xlu1 %1593  ;;  %2053 = vmatmul.mubr.msk.bf16.vlgmr.msra.gmra.mrb[48].mxu0 %vm84_vm1, %v1548_v48 }
0x165e   :  { %2061 = vmatmul.mubr.msk.bf16.vlgmr.msra.gmra.mrb[48].mxu1 %vm84_vm1, %v1594_v49  ;;  %2068 = vmatprep.mubr.msk.bf16.mxu0 %vm2160_vm0, %v2159_v1 }
0x1730   :  { %v1586_v50 = vpop.f32.mrb[48].mxu0 }
0x1731   :  { %v1632_v46 = vpop.f32.mrb[48].mxu1  ;;  %v2054_v51 = vpop.f32.mrb[49].mxu0 }
0x1732   :  { %v1633_v52 = vadd.f32 %v1632_v46, %v1586_v50  ;;  %v2062_v54 = vpop.f32.mrb[49].mxu1  ;;  %v1589_v55 = vpop.f32.mrb[50].mxu0 }
0x1733   :  { %v1635_v56 = vpop.f32.mrb[50].mxu1  ;;  %v2055_v57 = vpop.f32.mrb[51].mxu0 }
0x1734   :  { %v1638_v58 = vadd.f32 %v2346_v53, %v1633_v52  ;;  %v2063_v59 = vpop.f32.mrb[51].mxu1  ;;  %v2090_v53 = vld [vmem:[%s2678_s7] sm:$0xff]  }
0x1735   :  { %2065 = vmatpush3.bf16.msra.mxu0 %v2090_v53 }
0x1736   :  { %v1639_v44 = vmul.f32 %v1638_v58, %v2259_v19  ;;  %2066 = vmatprep.subr.bf16.mxu0 %v2159_v1 }
0x1738   :  { %2152 = vtanh.f32 %v1639_v44 }
0x1742   :  { %v2153_v60 = vpop.eup %2152 }
0x1743   :  { %v1641_v61 = vmul.f32 %v2153_v60, %v2259_v19  ;;  %v2091_v19 = vld [vmem:[%s2678_s7 + $0x8] sm:$0xff]  }
0x1744   :  { %2067 = vmatpush3.bf16.msra.mxu0 %v2091_v19 }
0x1745   :  { %v1642_v16 = vadd.f32 %v1641_v61, %v2264_v25 }
0x1747   :  { %1645 = vrot.lane.b32.xlu0 %v1642_v16, %s2163_s22  ;;  %v1643_v63 = vmul.f32 %v1642_v16, %v1474_v32 }
0x17b9   :  { %v1646_v62 = vpop.permute.xlu0 %1645 }
0x17ba   :  { %v1648_v35 = vmul.f32 %v1646_v62, %v1642_v16 }
0x17bc   :  { %1650 = vrot.lane.b32.xlu1 %v1648_v35, %s2164_s23 }
0x182e   :  { %v1651_v0 = vpop.permute.xlu1 %1650 }
0x182f   :  { %v1653_v3 = vadd.f32 %v1651_v0, %v1643_v63 }
0x1831   :  { %2154 = vtanh.f32 %v1653_v3 }
0x183b   :  { %v2155_v25 = vpop.eup %2154 }
0x183c   :  { %1656 = vrot.lane.b32.xlu0 %v2155_v25, %s2163_s22 }
0x18ae   :  { %v1657_v5 = vpop.permute.xlu0 %1656 }
0x18af   :  { %v1659_v6 = vmul.f32 %v1657_v5, %v1642_v16 }
0x18b1   :  { %v1660_v7 = vpack.c.bf16 %v1659_v6, %v1659_v6 }
0x18b3   :  { %1673 = vrot.lane.b32.xlu1 %v1660_v7, %s2164_s23 }
0x1925   :  { %v1674_v36 = vpop.permute.xlu1 %1673 }
0x1926   :  { %2069 = vmatmul.mubr.msk.bf16.vlgmr.msra.gmra.mrb[52].mxu0 %vm84_vm1, %v1674_v36 }
0x19f9   :  { %v1724_v8 = vpop.f32.mrb[52].mxu0 }
0x19fa   :  { %v1725_v37 = vadd.f32 %v1775_v11, %v1724_v8  ;;  %v2070_v9 = vpop.f32.mrb[53].mxu0 }
0x19fb   :  { %v1727_v1 = vpop.f32.mrb[54].mxu0 }
0x19fc   :  { %1730 = vst [vmem:[%s2680_s9] sm:$0xff] %v1725_v37  ;;  %v2071_v2 = vpop.f32.mrb[55].mxu0 }

</bundles_post_ra>
